<compile_context>
chip_gen: v7x
topology: tpu7x:2x2x1
jax: 0.10.0
libtpu: 0.0.40
codegen_flags: <defaults>
</compile_context>

<pallas_src>
import functools
import math

import jax
import jax.numpy as jnp
from jax.experimental import pallas as pl
from jax.experimental.pallas import tpu as pltpu


_VMEM = pltpu.MemorySpace.VMEM


# --------------------------------------------------------------------------
# Helpers
# --------------------------------------------------------------------------

def _ln(x, g, b, eps=1e-5):
    # LayerNorm over the last dim (matches torch.nn.LayerNorm, eps=1e-5).
    mean = jnp.mean(x, axis=-1, keepdims=True)
    var = jnp.mean(jnp.square(x - mean), axis=-1, keepdims=True)
    return (x - mean) * jax.lax.rsqrt(var + eps) * g + b


def _vmem_limit_bytes():
    # ~3/4 of physical VMEM, capped at 100 MiB:
    #   v5e/v6e (128 MiB) -> 96 MiB;   v7x (64 MiB) -> 48 MiB.
    cap = 128 << 20
    try:
        info = pltpu.get_tpu_info()
        cap = int(getattr(info, "vmem_capacity_bytes", cap))
    except Exception:
        pass
    return int(min(100 << 20, cap * 3 // 4))


def _pick_block_batch(batch, max_bb=4):
    # Largest divisor of `batch` (<= max_bb) that still leaves >= 2 grid
    # steps so both v7x TensorCores get work when batch >= 2.
    best = 1
    for bb in range(1, min(max_bb, batch) + 1):
        if batch % bb == 0 and batch // bb >= 2:
            best = bb
    return best


# --------------------------------------------------------------------------
# Embed kernel: patch-matmul + class token + positional embedding + ln_pre
# --------------------------------------------------------------------------

def _embed_kernel(patch_ref, w_ref, cls_ref, pos_ref, g_ref, b_ref, o_ref):
    pt = patch_ref[0].astype(jnp.bfloat16)                       # [N, C*P*P]
    emb = jnp.dot(pt, w_ref[...], preferred_element_type=jnp.float32)  # [N, D]
    pos = pos_ref[...]                                           # [S, D]
    cls_row = cls_ref[...] + pos[0:1, :]                         # [1, D]
    tok = jnp.concatenate([cls_row, emb + pos[1:, :]], axis=0)   # [S, D]
    # Single aligned, lane-dense store (no sublane-offset-1 partial stores).
    o_ref[0] = _ln(tok, g_ref[...], b_ref[...]).astype(o_ref.dtype)


def pallas_embed(patches, params):
    B, N, CPP = patches.shape
    D = params['conv_w'].shape[1]
    S = N + 1
    pspec = pl.BlockSpec((1, N, CPP), lambda i: (i, 0, 0))
    ospec = pl.BlockSpec((1, S, D), lambda i: (i, 0, 0))
    wspec = pl.BlockSpec(memory_space=_VMEM)   # whole-array, single-buffered
    return pl.pallas_call(
        _embed_kernel,
        out_shape=jax.ShapeDtypeStruct((B, S, D), jnp.bfloat16),
        grid=(B,),
        in_specs=[pspec, wspec, wspec, wspec, wspec, wspec],
        out_specs=ospec,
        compiler_params=pltpu.CompilerParams(
            dimension_semantics=("parallel",),
            vmem_limit_bytes=_vmem_limit_bytes()),
    )(patches, params['conv_w'], params['cls'], params['pos'],
      params['ln_pre_g'], params['ln_pre_b'])


# --------------------------------------------------------------------------
# Fused transformer layer kernel
#   x = x + MHA(ln_1(x));  x = x + MLP(ln_2(x))
# --------------------------------------------------------------------------

def _layer_kernel(x_ref, ln1_g, ln1_b, wqkv_ref, bqkv_ref, wo_ref, bo_ref,
                  ln2_g, ln2_b, w1_ref, b1_ref, w2_ref, b2_ref, o_ref,
                  ctx_ref, *, n_head, block_b):
    D = x_ref.shape[-1]
    dh = D // n_head

    for b in range(block_b):                     # static, small
        x = x_ref[b].astype(jnp.float32)         # [S, D] f32 working copy

        # ---- attention sub-block ----------------------------------------
        xn = _ln(x, ln1_g[...], ln1_b[...])
        # Packed in-projection: one [S, D] x [D, 3D] matmul.  The 1/sqrt(dh)
        # scale is already folded into the Q third of wqkv/bqkv.
        qkv = jnp.dot(xn.astype(jnp.bfloat16), wqkv_ref[...],
                      preferred_element_type=jnp.float32) + bqkv_ref[...]
        q = qkv[:, 0 * D:1 * D]
        k = qkv[:, 1 * D:2 * D]
        v = qkv[:, 2 * D:3 * D]

        for h in range(n_head):
            qh = q[:, h * dh:(h + 1) * dh].astype(jnp.bfloat16)
            kh = k[:, h * dh:(h + 1) * dh].astype(jnp.bfloat16)
            vh = v[:, h * dh:(h + 1) * dh].astype(jnp.bfloat16)
            # QK^T without an explicit transpose (MXU takes the transposed
            # operand directly via dot_general contracting dims (1, 1)).
            s = jax.lax.dot_general(qh, kh, (((1,), (1,)), ((), ())),
                                    preferred_element_type=jnp.float32)
            s = s - jnp.max(s, axis=-1, keepdims=True)
            p = jnp.exp(s)
            # approx reciprocal (EUP slot); tiny relative error vs exact div.
            inv = pl.reciprocal(jnp.sum(p, axis=-1, keepdims=True),
                                approx=True)
            ctx_h = jnp.dot(p.astype(jnp.bfloat16), vh,
                            preferred_element_type=jnp.float32) * inv
            # Per-head result goes straight to VMEM scratch: bounds live
            # ranges, no lane-axis concatenate.
            ctx_ref[:, h * dh:(h + 1) * dh] = ctx_h

        # Packed out-projection: one [S, D] x [D, D] matmul.
        attn = jnp.dot(ctx_ref[...].astype(jnp.bfloat16), wo_ref[...],
                       preferred_element_type=jnp.float32) + bo_ref[...]
        x = x + attn

        # ---- MLP sub-block ------------------------------------------------
        xn2 = _ln(x, ln2_g[...], ln2_b[...])
        h1 = jnp.dot(xn2.astype(jnp.bfloat16), w1_ref[...],
                     preferred_element_type=jnp.float32) + b1_ref[...]
        # QuickGELU in f32, immediately held as bf16 for the second matmul.
        h1 = (h1 * jax.nn.sigmoid(1.702 * h1)).astype(jnp.bfloat16)
        y = jnp.dot(h1, w2_ref[...],
                    preferred_element_type=jnp.float32) + b2_ref[...]
        o_ref[b] = (x + y).astype(o_ref.dtype)


def pallas_layer_block(x, p, *, heads, block_b):
    B, S, D = x.shape
    kernel = functools.partial(_layer_kernel, n_head=heads, block_b=block_b)
    xspec = pl.BlockSpec((block_b, S, D), lambda i: (i, 0, 0))
    wspec = pl.BlockSpec(memory_space=_VMEM)   # whole-array, single-buffered

    flops = int(B * S * D * (24 * D + 4 * S))
    trans = int(B * S * (heads * S + 4 * D))
    bytes_acc = int(2 * B * S * D * 2 + 12 * D * D * 2 + 14 * D * 4)

    return pl.pallas_call(
        kernel,
        out_shape=jax.ShapeDtypeStruct((B, S, D), jnp.bfloat16),
        grid=(B // block_b,),
        in_specs=[xspec] + [wspec] * 12,
        out_specs=xspec,
        scratch_shapes=[pltpu.VMEM((S, D), jnp.float32)],
        input_output_aliases={0: 0},
        compiler_params=pltpu.CompilerParams(
            dimension_semantics=("parallel",),
            vmem_limit_bytes=_vmem_limit_bytes()),
        cost_estimate=pl.CostEstimate(flops=flops, transcendentals=trans,
                                      bytes_accessed=bytes_acc),
    )(x, p['ln1_g'], p['ln1_b'], p['wqkv'], p['bqkv'], p['wo'], p['bo'],
      p['ln2_g'], p['ln2_b'], p['w1'], p['b1'], p['w2'], p['b2'])


# --------------------------------------------------------------------------
# Head kernel: ln_post on CLS token + final projection
# --------------------------------------------------------------------------

def _head_kernel(x_ref, g_ref, b_ref, proj_ref, o_ref):
    xn = _ln(x_ref[...].astype(jnp.float32), g_ref[...], b_ref[...])
    o_ref[...] = jnp.dot(xn.astype(jnp.bfloat16), proj_ref[...],
                         preferred_element_type=jnp.float32).astype(o_ref.dtype)


def pallas_head(cls_tok, params):
    B, D = cls_tok.shape
    O = params['proj'].shape[1]
    return pl.pallas_call(
        _head_kernel,
        out_shape=jax.ShapeDtypeStruct((B, O), jnp.float32),
        in_specs=[pl.BlockSpec(memory_space=_VMEM)] * 4,
        out_specs=pl.BlockSpec(memory_space=_VMEM),
        compiler_params=pltpu.CompilerParams(
            vmem_limit_bytes=_vmem_limit_bytes()),
    )(cls_tok, params['ln_post_g'], params['ln_post_b'], params['proj'])


# --------------------------------------------------------------------------
# Parameters (deterministic synthetic init — mirrors the module's __init__)
# --------------------------------------------------------------------------

def _binarize(mask_real, threshold):
    return (mask_real > threshold).astype(jnp.float32)


def init_params(key, *, input_resolution, patch_size, width, layers, heads,
                output_dim, mask_scale=0.01, threshold=0.005):
    D = width
    n_tokens = (input_resolution // patch_size) ** 2 + 1
    scale = width ** (-0.5)
    attn_scale = 1.0 / math.sqrt(D // heads)
    keys = iter(jax.random.split(key, 8 + 8 * layers))

    def nrm(shape, std=0.02):
        return std * jax.random.normal(next(keys), shape, dtype=jnp.float32)

    def masked(w):
        # ElementWise* layers: weight * binarized(mask_real); mask_real is
        # initialized to mask_scale > threshold => all-ones mask, folded here.
        return w * _binarize(mask_scale * jnp.ones_like(w), threshold)

    conv_w = masked(nrm((width, 3, patch_size, patch_size)))
    conv_w_mat = conv_w.reshape(width, -1).T.astype(jnp.bfloat16)  # [3*P*P, D]

    params = {
        'conv_w': conv_w_mat,
        'cls': scale * jax.random.normal(next(keys), (1, width), jnp.float32),
        'pos': scale * jax.random.normal(next(keys), (n_tokens, width),
                                         jnp.float32),
        'ln_pre_g': jnp.ones((1, D), jnp.float32),
        'ln_pre_b': jnp.zeros((1, D), jnp.float32),
        'ln_post_g': jnp.ones((1, D), jnp.float32),
        'ln_post_b': jnp.zeros((1, D), jnp.float32),
        'proj': (scale * jax.random.normal(next(keys), (width, output_dim),
                                           jnp.float32)).astype(jnp.bfloat16),
        'layers': [],
    }

    for _ in range(layers):
        in_proj_w = masked(nrm((3 * D, D)))     # torch MHA in_proj_weight
        in_proj_b = nrm((3 * D,))
        out_w = masked(nrm((D, D)))             # out_proj.weight
        out_b = nrm((D,))
        w_fc = masked(nrm((4 * D, D)))          # c_fc.weight
        b_fc = nrm((4 * D,))
        w_pr = masked(nrm((D, 4 * D)))          # c_proj.weight
        b_pr = nrm((D,))

        # Packed projections in x @ W^T layout; fold 1/sqrt(dh) into Q.
        wqkv = in_proj_w.T                                    # [D, 3D]
        wqkv = wqkv.at[:, :D].multiply(attn_scale)
        bqkv = in_proj_b.at[:D].multiply(attn_scale)

        params['layers'].append({
            'ln1_g': jnp.ones((1, D), jnp.float32),
            'ln1_b': jnp.zeros((1, D), jnp.float32),
            'ln2_g': jnp.ones((1, D), jnp.float32),
            'ln2_b': jnp.zeros((1, D), jnp.float32),
            'wqkv': wqkv.astype(jnp.bfloat16),                # [D, 3D]
            'bqkv': bqkv.reshape(1, 3 * D),
            'wo': out_w.T.astype(jnp.bfloat16),               # [D, D]
            'bo': out_b.reshape(1, D),
            'w1': w_fc.T.astype(jnp.bfloat16),                # [D, 4D]
            'b1': b_fc.reshape(1, 4 * D),
            'w2': w_pr.T.astype(jnp.bfloat16),                # [4D, D]
            'b2': b_pr.reshape(1, D),
        })
    return params


# --------------------------------------------------------------------------
# Forward pass
# --------------------------------------------------------------------------

def mask_vit_forward(x, params, *, patch_size, heads):
    B, C, H, W = x.shape
    P = patch_size
    Hp, Wp = H // P, W // P
    N = Hp * Wp

    # conv1 (stride == kernel, no bias)  ==  patch extraction + matmul.
    patches = (x.reshape(B, C, Hp, P, Wp, P)
                 .transpose(0, 2, 4, 1, 3, 5)
                 .reshape(B, N, C * P * P))               # (c, ph, pw) ordering

    # patch embed + class token + positional embedding + ln_pre (fused)
    xt = pallas_embed(patches, params)                    # [B, S, D] bf16

    # transformer: one fused kernel per residual-attention block
    block_b = _pick_block_batch(B)
    for layer_p in params['layers']:
        xt = pallas_layer_block(xt, layer_p, heads=heads, block_b=block_b)

    # ln_post on CLS token + projection (fused)
    return pallas_head(xt[:, 0, :], params)               # [B, output_dim]


# --------------------------------------------------------------------------
# Demo
# --------------------------------------------------------------------------

if __name__ == "__main__":
    # small config: input_resolution=16, patch_size=8, width=32, layers=2,
    # heads=4, output_dim=16, batch=2   (seq = (16/8)^2 + 1 = 5 tokens)
    input_resolution = 16
    patch_size = 8
    width = 32
    layers = 2
    heads = 4
    output_dim = 16
    batch = 2

    key = jax.random.PRNGKey(0)
    k_params, k_x = jax.random.split(key)
    params = init_params(k_params, input_resolution=input_resolution,
                         patch_size=patch_size, width=width, layers=layers,
                         heads=heads, output_dim=output_dim)

    x = jax.random.normal(k_x, (batch, 3, input_resolution, input_resolution),
                          dtype=jnp.float32)

    fwd = jax.jit(functools.partial(mask_vit_forward,
                                    patch_size=patch_size, heads=heads))
    out = fwd(x, params)
    out = jax.block_until_ready(out)
    assert out.shape == (batch, output_dim), out.shape
    assert bool(jnp.all(jnp.isfinite(out)))
    print("KERNEL_OK")
</pallas_src>

<mosaic_0001>
module attributes {stable_mosaic.version = 11 : i64} {
  func.func @_embed_kernel(%arg0: i32, %arg1: memref<1x4x192xf32, #tpu.memory_space<vmem>>, %arg2: memref<192x32xbf16, #tpu.memory_space<vmem>>, %arg3: memref<1x32xf32, #tpu.memory_space<vmem>>, %arg4: memref<5x32xf32, #tpu.memory_space<vmem>>, %arg5: memref<1x32xf32, #tpu.memory_space<vmem>>, %arg6: memref<1x32xf32, #tpu.memory_space<vmem>>, %arg7: memref<1x5x32xbf16, #tpu.memory_space<vmem>>) attributes {dimension_semantics = [#tpu.dimension_semantics<parallel>], iteration_bounds = array<i64: 2>, scalar_prefetch = 0 : i64, scratch_operands = 0 : i64, tpu.core_type = #tpu.core_type<tc>, window_params = [{transform_indices = @transform_0, window_bounds = array<i64: 1, 4, 192>}, {pipeline_mode = #tpu.pipeline_mode<synchronous>, transform_indices = @transform_1, window_bounds = array<i64: 192, 32>}, {pipeline_mode = #tpu.pipeline_mode<synchronous>, transform_indices = @transform_2, window_bounds = array<i64: 1, 32>}, {pipeline_mode = #tpu.pipeline_mode<synchronous>, transform_indices = @transform_3, window_bounds = array<i64: 5, 32>}, {pipeline_mode = #tpu.pipeline_mode<synchronous>, transform_indices = @transform_4, window_bounds = array<i64: 1, 32>}, {pipeline_mode = #tpu.pipeline_mode<synchronous>, transform_indices = @transform_5, window_bounds = array<i64: 1, 32>}, {transform_indices = @transform_6, window_bounds = array<i64: 1, 5, 32>}]} {
    %c0 = arith.constant 0 : index
    %c0_0 = arith.constant 0 : index
    %c0_1 = arith.constant 0 : index
    %0 = vector.load %arg1[%c0, %c0_0, %c0_1] : memref<1x4x192xf32, #tpu.memory_space<vmem>>, vector<1x4x192xf32>
    %1 = vector.shape_cast %0 : vector<1x4x192xf32> to vector<4x192xf32>
    %2 = arith.truncf %1 : vector<4x192xf32> to vector<4x192xbf16>
    %c0_2 = arith.constant 0 : index
    %c0_3 = arith.constant 0 : index
    %3 = vector.load %arg2[%c0_2, %c0_3] : memref<192x32xbf16, #tpu.memory_space<vmem>>, vector<192x32xbf16>
    %cst = arith.constant dense<0.000000e+00> : vector<4x32xf32>
    %4 = tpu.matmul %2, %3, %cst {dimension_numbers = #tpu.dot_dimension_numbers<[1], [0], [0], [1], [0, 0, 1, 1], [], []>} : vector<4x192xbf16>, vector<192x32xbf16>, vector<4x32xf32> -> vector<4x32xf32>
    %c0_4 = arith.constant 0 : index
    %c0_5 = arith.constant 0 : index
    %5 = vector.load %arg4[%c0_4, %c0_5] : memref<5x32xf32, #tpu.memory_space<vmem>>, vector<5x32xf32>
    %c0_6 = arith.constant 0 : index
    %c0_7 = arith.constant 0 : index
    %6 = vector.load %arg3[%c0_6, %c0_7] : memref<1x32xf32, #tpu.memory_space<vmem>>, vector<1x32xf32>
    %7 = vector.extract_strided_slice %5 {offsets = [0, 0], sizes = [1, 32], strides = [1, 1]} : vector<5x32xf32> to vector<1x32xf32>
    %8 = arith.addf %6, %7 : vector<1x32xf32>
    %9 = vector.extract_strided_slice %5 {offsets = [1, 0], sizes = [4, 32], strides = [1, 1]} : vector<5x32xf32> to vector<4x32xf32>
    %10 = arith.addf %4, %9 : vector<4x32xf32>
    %11 = tpu.concatenate %8, %10 in 0 : vector<1x32xf32>, vector<4x32xf32> -> vector<5x32xf32>
    %c0_8 = arith.constant 0 : index
    %c0_9 = arith.constant 0 : index
    %12 = vector.load %arg5[%c0_8, %c0_9] : memref<1x32xf32, #tpu.memory_space<vmem>>, vector<1x32xf32>
    %c0_10 = arith.constant 0 : index
    %c0_11 = arith.constant 0 : index
    %13 = vector.load %arg6[%c0_10, %c0_11] : memref<1x32xf32, #tpu.memory_space<vmem>>, vector<1x32xf32>
    %cst_12 = arith.constant dense<0.000000e+00> : vector<5xf32>
    %14 = vector.multi_reduction <add>, %11, %cst_12 [1] : vector<5x32xf32> to vector<5xf32>
    %15 = vector.shape_cast %14 : vector<5xf32> to vector<5x1xf32>
    %cst_13 = arith.constant 3.200000e+01 : f32
    %16 = vector.broadcast %cst_13 : f32 to vector<5x1xf32>
    %17 = arith.divf %15, %16 : vector<5x1xf32>
    %18 = vector.broadcast %17 : vector<5x1xf32> to vector<5x32xf32>
    %19 = arith.subf %11, %18 : vector<5x32xf32>
    %20 = arith.mulf %19, %19 : vector<5x32xf32>
    %cst_14 = arith.constant dense<0.000000e+00> : vector<5xf32>
    %21 = vector.multi_reduction <add>, %20, %cst_14 [1] : vector<5x32xf32> to vector<5xf32>
    %22 = vector.shape_cast %21 : vector<5xf32> to vector<5x1xf32>
    %cst_15 = arith.constant 3.200000e+01 : f32
    %23 = vector.broadcast %cst_15 : f32 to vector<5x1xf32>
    %24 = arith.divf %22, %23 : vector<5x1xf32>
    %25 = vector.broadcast %17 : vector<5x1xf32> to vector<5x32xf32>
    %26 = arith.subf %11, %25 : vector<5x32xf32>
    %cst_16 = arith.constant 9.99999974E-6 : f32
    %27 = vector.broadcast %cst_16 : f32 to vector<5x1xf32>
    %28 = arith.addf %24, %27 : vector<5x1xf32>
    %29 = math.rsqrt %28 : vector<5x1xf32>
    %30 = vector.broadcast %29 : vector<5x1xf32> to vector<5x32xf32>
    %31 = arith.mulf %26, %30 : vector<5x32xf32>
    %32 = vector.broadcast %12 : vector<1x32xf32> to vector<5x32xf32>
    %33 = arith.mulf %31, %32 : vector<5x32xf32>
    %34 = vector.broadcast %13 : vector<1x32xf32> to vector<5x32xf32>
    %35 = arith.addf %33, %34 : vector<5x32xf32>
    %36 = arith.truncf %35 : vector<5x32xf32> to vector<5x32xbf16>
    %c0_17 = arith.constant 0 : index
    %c0_18 = arith.constant 0 : index
    %c0_19 = arith.constant 0 : index
    %37 = vector.load %arg7[%c0_17, %c0_18, %c0_19] : memref<1x5x32xbf16, #tpu.memory_space<vmem>>, vector<1x5x32xbf16>
    %38 = vector.shape_cast %37 : vector<1x5x32xbf16> to vector<5x32xbf16>
    %39 = vector.shape_cast %36 : vector<5x32xbf16> to vector<1x5x32xbf16>
    tpu.vector_store %arg7[%c0_17, %c0_18, %c0_19], %39 {strides = array<i32>} : memref<1x5x32xbf16, #tpu.memory_space<vmem>>, vector<1x5x32xbf16>,
    return
  }
  func.func @transform_0(%arg0: i32) -> (i32, i32, i32) {
    %c0_i32 = arith.constant 0 : i32
    %c0_i32_0 = arith.constant 0 : i32
    %c0_i32_1 = arith.constant 0 : i32
    return %arg0, %c0_i32, %c0_i32_0 : i32, i32, i32
  }
  func.func @transform_1(%arg0: i32) -> (i32, i32) {
    %c0_i32 = arith.constant 0 : i32
    %c0_i32_0 = arith.constant 0 : i32
    %c0_i32_1 = arith.constant 0 : i32
    return %c0_i32, %c0_i32_0 : i32, i32
  }
  func.func @transform_2(%arg0: i32) -> (i32, i32) {
    %c0_i32 = arith.constant 0 : i32
    %c0_i32_0 = arith.constant 0 : i32
    %c0_i32_1 = arith.constant 0 : i32
    return %c0_i32, %c0_i32_0 : i32, i32
  }
  func.func @transform_3(%arg0: i32) -> (i32, i32) {
    %c0_i32 = arith.constant 0 : i32
    %c0_i32_0 = arith.constant 0 : i32
    %c0_i32_1 = arith.constant 0 : i32
    return %c0_i32, %c0_i32_0 : i32, i32
  }
  func.func @transform_4(%arg0: i32) -> (i32, i32) {
    %c0_i32 = arith.constant 0 : i32
    %c0_i32_0 = arith.constant 0 : i32
    %c0_i32_1 = arith.constant 0 : i32
    return %c0_i32, %c0_i32_0 : i32, i32
  }
  func.func @transform_5(%arg0: i32) -> (i32, i32) {
    %c0_i32 = arith.constant 0 : i32
    %c0_i32_0 = arith.constant 0 : i32
    %c0_i32_1 = arith.constant 0 : i32
    return %c0_i32, %c0_i32_0 : i32, i32
  }
  func.func @transform_6(%arg0: i32) -> (i32, i32, i32) {
    %c0_i32 = arith.constant 0 : i32
    %c0_i32_0 = arith.constant 0 : i32
    %c0_i32_1 = arith.constant 0 : i32
    return %arg0, %c0_i32, %c0_i32_0 : i32, i32, i32
  }
}

module attributes {stable_mosaic.version = 11 : i64} {
  func.func @_layer_kernel(%arg0: i32, %arg1: memref<1x5x32xbf16, #tpu.memory_space<vmem>>, %arg2: memref<1x32xf32, #tpu.memory_space<vmem>>, %arg3: memref<1x32xf32, #tpu.memory_space<vmem>>, %arg4: memref<32x96xbf16, #tpu.memory_space<vmem>>, %arg5: memref<1x96xf32, #tpu.memory_space<vmem>>, %arg6: memref<32x32xbf16, #tpu.memory_space<vmem>>, %arg7: memref<1x32xf32, #tpu.memory_space<vmem>>, %arg8: memref<1x32xf32, #tpu.memory_space<vmem>>, %arg9: memref<1x32xf32, #tpu.memory_space<vmem>>, %arg10: memref<32x128xbf16, #tpu.memory_space<vmem>>, %arg11: memref<1x128xf32, #tpu.memory_space<vmem>>, %arg12: memref<128x32xbf16, #tpu.memory_space<vmem>>, %arg13: memref<1x32xf32, #tpu.memory_space<vmem>>, %arg14: memref<1x5x32xbf16, #tpu.memory_space<vmem>>, %arg15: memref<5x32xf32, #tpu.memory_space<vmem>>) attributes {dimension_semantics = [#tpu.dimension_semantics<parallel>], iteration_bounds = array<i64: 2>, scalar_prefetch = 0 : i64, scratch_operands = 1 : i64, tpu.core_type = #tpu.core_type<tc>, window_params = [{transform_indices = @transform_0, window_bounds = array<i64: 1, 5, 32>}, {pipeline_mode = #tpu.pipeline_mode<synchronous>, transform_indices = @transform_1, window_bounds = array<i64: 1, 32>}, {pipeline_mode = #tpu.pipeline_mode<synchronous>, transform_indices = @transform_2, window_bounds = array<i64: 1, 32>}, {pipeline_mode = #tpu.pipeline_mode<synchronous>, transform_indices = @transform_3, window_bounds = array<i64: 32, 96>}, {pipeline_mode = #tpu.pipeline_mode<synchronous>, transform_indices = @transform_4, window_bounds = array<i64: 1, 96>}, {pipeline_mode = #tpu.pipeline_mode<synchronous>, transform_indices = @transform_5, window_bounds = array<i64: 32, 32>}, {pipeline_mode = #tpu.pipeline_mode<synchronous>, transform_indices = @transform_6, window_bounds = array<i64: 1, 32>}, {pipeline_mode = #tpu.pipeline_mode<synchronous>, transform_indices = @transform_7, window_bounds = array<i64: 1, 32>}, {pipeline_mode = #tpu.pipeline_mode<synchronous>, transform_indices = @transform_8, window_bounds = array<i64: 1, 32>}, {pipeline_mode = #tpu.pipeline_mode<synchronous>, transform_indices = @transform_9, window_bounds = array<i64: 32, 128>}, {pipeline_mode = #tpu.pipeline_mode<synchronous>, transform_indices = @transform_10, window_bounds = array<i64: 1, 128>}, {pipeline_mode = #tpu.pipeline_mode<synchronous>, transform_indices = @transform_11, window_bounds = array<i64: 128, 32>}, {pipeline_mode = #tpu.pipeline_mode<synchronous>, transform_indices = @transform_12, window_bounds = array<i64: 1, 32>}, {transform_indices = @transform_13, window_bounds = array<i64: 1, 5, 32>}]} {
    %c0 = arith.constant 0 : index
    %c0_0 = arith.constant 0 : index
    %c0_1 = arith.constant 0 : index
    %0 = vector.load %arg1[%c0, %c0_0, %c0_1] : memref<1x5x32xbf16, #tpu.memory_space<vmem>>, vector<1x5x32xbf16>
    %1 = vector.shape_cast %0 : vector<1x5x32xbf16> to vector<5x32xbf16>
    %2 = arith.extf %1 : vector<5x32xbf16> to vector<5x32xf32>
    %c0_2 = arith.constant 0 : index
    %c0_3 = arith.constant 0 : index
    %3 = vector.load %arg2[%c0_2, %c0_3] : memref<1x32xf32, #tpu.memory_space<vmem>>, vector<1x32xf32>
    %c0_4 = arith.constant 0 : index
    %c0_5 = arith.constant 0 : index
    %4 = vector.load %arg3[%c0_4, %c0_5] : memref<1x32xf32, #tpu.memory_space<vmem>>, vector<1x32xf32>
    %cst = arith.constant dense<0.000000e+00> : vector<5xf32>
    %5 = vector.multi_reduction <add>, %2, %cst [1] : vector<5x32xf32> to vector<5xf32>
    %6 = vector.shape_cast %5 : vector<5xf32> to vector<5x1xf32>
    %cst_6 = arith.constant 3.200000e+01 : f32
    %7 = vector.broadcast %cst_6 : f32 to vector<5x1xf32>
    %8 = arith.divf %6, %7 : vector<5x1xf32>
    %9 = vector.broadcast %8 : vector<5x1xf32> to vector<5x32xf32>
    %10 = arith.subf %2, %9 : vector<5x32xf32>
    %11 = arith.mulf %10, %10 : vector<5x32xf32>
    %cst_7 = arith.constant dense<0.000000e+00> : vector<5xf32>
    %12 = vector.multi_reduction <add>, %11, %cst_7 [1] : vector<5x32xf32> to vector<5xf32>
    %13 = vector.shape_cast %12 : vector<5xf32> to vector<5x1xf32>
    %cst_8 = arith.constant 3.200000e+01 : f32
    %14 = vector.broadcast %cst_8 : f32 to vector<5x1xf32>
    %15 = arith.divf %13, %14 : vector<5x1xf32>
    %16 = vector.broadcast %8 : vector<5x1xf32> to vector<5x32xf32>
    %17 = arith.subf %2, %16 : vector<5x32xf32>
    %cst_9 = arith.constant 9.99999974E-6 : f32
    %18 = vector.broadcast %cst_9 : f32 to vector<5x1xf32>
    %19 = arith.addf %15, %18 : vector<5x1xf32>
    %20 = math.rsqrt %19 : vector<5x1xf32>
    %21 = vector.broadcast %20 : vector<5x1xf32> to vector<5x32xf32>
    %22 = arith.mulf %17, %21 : vector<5x32xf32>
    %23 = vector.broadcast %3 : vector<1x32xf32> to vector<5x32xf32>
    %24 = arith.mulf %22, %23 : vector<5x32xf32>
    %25 = vector.broadcast %4 : vector<1x32xf32> to vector<5x32xf32>
    %26 = arith.addf %24, %25 : vector<5x32xf32>
    %27 = arith.truncf %26 : vector<5x32xf32> to vector<5x32xbf16>
    %c0_10 = arith.constant 0 : index
    %c0_11 = arith.constant 0 : index
    %28 = vector.load %arg4[%c0_10, %c0_11] : memref<32x96xbf16, #tpu.memory_space<vmem>>, vector<32x96xbf16>
    %cst_12 = arith.constant dense<0.000000e+00> : vector<5x96xf32>
    %29 = tpu.matmul %27, %28, %cst_12 {dimension_numbers = #tpu.dot_dimension_numbers<[1], [0], [0], [1], [0, 0, 1, 1], [], []>} : vector<5x32xbf16>, vector<32x96xbf16>, vector<5x96xf32> -> vector<5x96xf32>
    %c0_13 = arith.constant 0 : index
    %c0_14 = arith.constant 0 : index
    %30 = vector.load %arg5[%c0_13, %c0_14] : memref<1x96xf32, #tpu.memory_space<vmem>>, vector<1x96xf32>
    %31 = vector.broadcast %30 : vector<1x96xf32> to vector<5x96xf32>
    %32 = arith.addf %29, %31 : vector<5x96xf32>
    %33 = vector.extract_strided_slice %32 {offsets = [0, 0], sizes = [5, 32], strides = [1, 1]} : vector<5x96xf32> to vector<5x32xf32>
    %34 = vector.extract_strided_slice %32 {offsets = [0, 32], sizes = [5, 32], strides = [1, 1]} : vector<5x96xf32> to vector<5x32xf32>
    %35 = vector.extract_strided_slice %32 {offsets = [0, 64], sizes = [5, 32], strides = [1, 1]} : vector<5x96xf32> to vector<5x32xf32>
    %36 = vector.extract_strided_slice %33 {offsets = [0, 0], sizes = [5, 8], strides = [1, 1]} : vector<5x32xf32> to vector<5x8xf32>
    %37 = arith.truncf %36 : vector<5x8xf32> to vector<5x8xbf16>
    %38 = vector.extract_strided_slice %34 {offsets = [0, 0], sizes = [5, 8], strides = [1, 1]} : vector<5x32xf32> to vector<5x8xf32>
    %39 = arith.truncf %38 : vector<5x8xf32> to vector<5x8xbf16>
    %40 = vector.extract_strided_slice %35 {offsets = [0, 0], sizes = [5, 8], strides = [1, 1]} : vector<5x32xf32> to vector<5x8xf32>
    %41 = arith.truncf %40 : vector<5x8xf32> to vector<5x8xbf16>
    %cst_15 = arith.constant dense<0.000000e+00> : vector<5x5xf32>
    %42 = tpu.matmul %37, %39, %cst_15 {dimension_numbers = #tpu.dot_dimension_numbers<[1], [1], [0], [0], [0, 0, 1, 0], [], []>} : vector<5x8xbf16>, vector<5x8xbf16>, vector<5x5xf32> -> vector<5x5xf32>
    %cst_16 = arith.constant dense<0xFF800000> : vector<5xf32>
    %43 = vector.multi_reduction <maximumf>, %42, %cst_16 [1] : vector<5x5xf32> to vector<5xf32>
    %44 = vector.shape_cast %43 : vector<5xf32> to vector<5x1xf32>
    %45 = vector.broadcast %44 : vector<5x1xf32> to vector<5x5xf32>
    %46 = arith.subf %42, %45 : vector<5x5xf32>
    %47 = math.exp %46 : vector<5x5xf32>
    %cst_17 = arith.constant dense<0.000000e+00> : vector<5xf32>
    %48 = vector.multi_reduction <add>, %47, %cst_17 [1] : vector<5x5xf32> to vector<5xf32>
    %49 = vector.shape_cast %48 : vector<5xf32> to vector<5x1xf32>
    %50 = tpu.reciprocal %49 {approx = true} : vector<5x1xf32> -> vector<5x1xf32>
    %51 = arith.truncf %47 : vector<5x5xf32> to vector<5x5xbf16>
    %cst_18 = arith.constant dense<0.000000e+00> : vector<5x8xf32>
    %52 = tpu.matmul %51, %41, %cst_18 {dimension_numbers = #tpu.dot_dimension_numbers<[1], [0], [0], [1], [0, 0, 1, 1], [], []>} : vector<5x5xbf16>, vector<5x8xbf16>, vector<5x8xf32> -> vector<5x8xf32>
    %53 = vector.broadcast %50 : vector<5x1xf32> to vector<5x8xf32>
    %54 = arith.mulf %52, %53 : vector<5x8xf32>
    %c0_19 = arith.constant 0 : index
    %c0_20 = arith.constant 0 : index
    %55 = vector.load %arg15[%c0_19, %c0_20] : memref<5x32xf32, #tpu.memory_space<vmem>>, vector<5x8xf32>
    tpu.vector_store %arg15[%c0_19, %c0_20], %54 {strides = array<i32>} : memref<5x32xf32, #tpu.memory_space<vmem>>, vector<5x8xf32>,
    %56 = vector.extract_strided_slice %33 {offsets = [0, 8], sizes = [5, 8], strides = [1, 1]} : vector<5x32xf32> to vector<5x8xf32>
    %57 = arith.truncf %56 : vector<5x8xf32> to vector<5x8xbf16>
    %58 = vector.extract_strided_slice %34 {offsets = [0, 8], sizes = [5, 8], strides = [1, 1]} : vector<5x32xf32> to vector<5x8xf32>
    %59 = arith.truncf %58 : vector<5x8xf32> to vector<5x8xbf16>
    %60 = vector.extract_strided_slice %35 {offsets = [0, 8], sizes = [5, 8], strides = [1, 1]} : vector<5x32xf32> to vector<5x8xf32>
    %61 = arith.truncf %60 : vector<5x8xf32> to vector<5x8xbf16>
    %cst_21 = arith.constant dense<0.000000e+00> : vector<5x5xf32>
    %62 = tpu.matmul %57, %59, %cst_21 {dimension_numbers = #tpu.dot_dimension_numbers<[1], [1], [0], [0], [0, 0, 1, 0], [], []>} : vector<5x8xbf16>, vector<5x8xbf16>, vector<5x5xf32> -> vector<5x5xf32>
    %cst_22 = arith.constant dense<0xFF800000> : vector<5xf32>
    %63 = vector.multi_reduction <maximumf>, %62, %cst_22 [1] : vector<5x5xf32> to vector<5xf32>
    %64 = vector.shape_cast %63 : vector<5xf32> to vector<5x1xf32>
    %65 = vector.broadcast %64 : vector<5x1xf32> to vector<5x5xf32>
    %66 = arith.subf %62, %65 : vector<5x5xf32>
    %67 = math.exp %66 : vector<5x5xf32>
    %cst_23 = arith.constant dense<0.000000e+00> : vector<5xf32>
    %68 = vector.multi_reduction <add>, %67, %cst_23 [1] : vector<5x5xf32> to vector<5xf32>
    %69 = vector.shape_cast %68 : vector<5xf32> to vector<5x1xf32>
    %70 = tpu.reciprocal %69 {approx = true} : vector<5x1xf32> -> vector<5x1xf32>
    %71 = arith.truncf %67 : vector<5x5xf32> to vector<5x5xbf16>
    %cst_24 = arith.constant dense<0.000000e+00> : vector<5x8xf32>
    %72 = tpu.matmul %71, %61, %cst_24 {dimension_numbers = #tpu.dot_dimension_numbers<[1], [0], [0], [1], [0, 0, 1, 1], [], []>} : vector<5x5xbf16>, vector<5x8xbf16>, vector<5x8xf32> -> vector<5x8xf32>
    %73 = vector.broadcast %70 : vector<5x1xf32> to vector<5x8xf32>
    %74 = arith.mulf %72, %73 : vector<5x8xf32>
    %c0_25 = arith.constant 0 : index
    %c8 = arith.constant 8 : index
    %75 = vector.load %arg15[%c0_25, %c8] : memref<5x32xf32, #tpu.memory_space<vmem>>, vector<5x8xf32>
    tpu.vector_store %arg15[%c0_25, %c8], %74 {strides = array<i32>} : memref<5x32xf32, #tpu.memory_space<vmem>>, vector<5x8xf32>,
    %76 = vector.extract_strided_slice %33 {offsets = [0, 16], sizes = [5, 8], strides = [1, 1]} : vector<5x32xf32> to vector<5x8xf32>
    %77 = arith.truncf %76 : vector<5x8xf32> to vector<5x8xbf16>
    %78 = vector.extract_strided_slice %34 {offsets = [0, 16], sizes = [5, 8], strides = [1, 1]} : vector<5x32xf32> to vector<5x8xf32>
    %79 = arith.truncf %78 : vector<5x8xf32> to vector<5x8xbf16>
    %80 = vector.extract_strided_slice %35 {offsets = [0, 16], sizes = [5, 8], strides = [1, 1]} : vector<5x32xf32> to vector<5x8xf32>
    %81 = arith.truncf %80 : vector<5x8xf32> to vector<5x8xbf16>
    %cst_26 = arith.constant dense<0.000000e+00> : vector<5x5xf32>
    %82 = tpu.matmul %77, %79, %cst_26 {dimension_numbers = #tpu.dot_dimension_numbers<[1], [1], [0], [0], [0, 0, 1, 0], [], []>} : vector<5x8xbf16>, vector<5x8xbf16>, vector<5x5xf32> -> vector<5x5xf32>
    %cst_27 = arith.constant dense<0xFF800000> : vector<5xf32>
    %83 = vector.multi_reduction <maximumf>, %82, %cst_27 [1] : vector<5x5xf32> to vector<5xf32>
    %84 = vector.shape_cast %83 : vector<5xf32> to vector<5x1xf32>
    %85 = vector.broadcast %84 : vector<5x1xf32> to vector<5x5xf32>
    %86 = arith.subf %82, %85 : vector<5x5xf32>
    %87 = math.exp %86 : vector<5x5xf32>
    %cst_28 = arith.constant dense<0.000000e+00> : vector<5xf32>
    %88 = vector.multi_reduction <add>, %87, %cst_28 [1] : vector<5x5xf32> to vector<5xf32>
    %89 = vector.shape_cast %88 : vector<5xf32> to vector<5x1xf32>
    %90 = tpu.reciprocal %89 {approx = true} : vector<5x1xf32> -> vector<5x1xf32>
    %91 = arith.truncf %87 : vector<5x5xf32> to vector<5x5xbf16>
    %cst_29 = arith.constant dense<0.000000e+00> : vector<5x8xf32>
    %92 = tpu.matmul %91, %81, %cst_29 {dimension_numbers = #tpu.dot_dimension_numbers<[1], [0], [0], [1], [0, 0, 1, 1], [], []>} : vector<5x5xbf16>, vector<5x8xbf16>, vector<5x8xf32> -> vector<5x8xf32>
    %93 = vector.broadcast %90 : vector<5x1xf32> to vector<5x8xf32>
    %94 = arith.mulf %92, %93 : vector<5x8xf32>
    %c0_30 = arith.constant 0 : index
    %c16 = arith.constant 16 : index
    %95 = vector.load %arg15[%c0_30, %c16] : memref<5x32xf32, #tpu.memory_space<vmem>>, vector<5x8xf32>
    tpu.vector_store %arg15[%c0_30, %c16], %94 {strides = array<i32>} : memref<5x32xf32, #tpu.memory_space<vmem>>, vector<5x8xf32>,
    %96 = vector.extract_strided_slice %33 {offsets = [0, 24], sizes = [5, 8], strides = [1, 1]} : vector<5x32xf32> to vector<5x8xf32>
    %97 = arith.truncf %96 : vector<5x8xf32> to vector<5x8xbf16>
    %98 = vector.extract_strided_slice %34 {offsets = [0, 24], sizes = [5, 8], strides = [1, 1]} : vector<5x32xf32> to vector<5x8xf32>
    %99 = arith.truncf %98 : vector<5x8xf32> to vector<5x8xbf16>
    %100 = vector.extract_strided_slice %35 {offsets = [0, 24], sizes = [5, 8], strides = [1, 1]} : vector<5x32xf32> to vector<5x8xf32>
    %101 = arith.truncf %100 : vector<5x8xf32> to vector<5x8xbf16>
    %cst_31 = arith.constant dense<0.000000e+00> : vector<5x5xf32>
    %102 = tpu.matmul %97, %99, %cst_31 {dimension_numbers = #tpu.dot_dimension_numbers<[1], [1], [0], [0], [0, 0, 1, 0], [], []>} : vector<5x8xbf16>, vector<5x8xbf16>, vector<5x5xf32> -> vector<5x5xf32>
    %cst_32 = arith.constant dense<0xFF800000> : vector<5xf32>
    %103 = vector.multi_reduction <maximumf>, %102, %cst_32 [1] : vector<5x5xf32> to vector<5xf32>
    %104 = vector.shape_cast %103 : vector<5xf32> to vector<5x1xf32>
    %105 = vector.broadcast %104 : vector<5x1xf32> to vector<5x5xf32>
    %106 = arith.subf %102, %105 : vector<5x5xf32>
    %107 = math.exp %106 : vector<5x5xf32>
    %cst_33 = arith.constant dense<0.000000e+00> : vector<5xf32>
    %108 = vector.multi_reduction <add>, %107, %cst_33 [1] : vector<5x5xf32> to vector<5xf32>
    %109 = vector.shape_cast %108 : vector<5xf32> to vector<5x1xf32>
    %110 = tpu.reciprocal %109 {approx = true} : vector<5x1xf32> -> vector<5x1xf32>
    %111 = arith.truncf %107 : vector<5x5xf32> to vector<5x5xbf16>
    %cst_34 = arith.constant dense<0.000000e+00> : vector<5x8xf32>
    %112 = tpu.matmul %111, %101, %cst_34 {dimension_numbers = #tpu.dot_dimension_numbers<[1], [0], [0], [1], [0, 0, 1, 1], [], []>} : vector<5x5xbf16>, vector<5x8xbf16>, vector<5x8xf32> -> vector<5x8xf32>
    %113 = vector.broadcast %110 : vector<5x1xf32> to vector<5x8xf32>
    %114 = arith.mulf %112, %113 : vector<5x8xf32>
    %c0_35 = arith.constant 0 : index
    %c24 = arith.constant 24 : index
    %115 = vector.load %arg15[%c0_35, %c24] : memref<5x32xf32, #tpu.memory_space<vmem>>, vector<5x8xf32>
    tpu.vector_store %arg15[%c0_35, %c24], %114 {strides = array<i32>} : memref<5x32xf32, #tpu.memory_space<vmem>>, vector<5x8xf32>,
    %c0_36 = arith.constant 0 : index
    %c0_37 = arith.constant 0 : index
    %116 = vector.load %arg15[%c0_36, %c0_37] : memref<5x32xf32, #tpu.memory_space<vmem>>, vector<5x32xf32>
    %117 = arith.truncf %116 : vector<5x32xf32> to vector<5x32xbf16>
    %c0_38 = arith.constant 0 : index
    %c0_39 = arith.constant 0 : index
    %118 = vector.load %arg6[%c0_38, %c0_39] : memref<32x32xbf16, #tpu.memory_space<vmem>>, vector<32x32xbf16>
    %cst_40 = arith.constant dense<0.000000e+00> : vector<5x32xf32>
    %119 = tpu.matmul %117, %118, %cst_40 {dimension_numbers = #tpu.dot_dimension_numbers<[1], [0], [0], [1], [0, 0, 1, 1], [], []>} : vector<5x32xbf16>, vector<32x32xbf16>, vector<5x32xf32> -> vector<5x32xf32>
    %c0_41 = arith.constant 0 : index
    %c0_42 = arith.constant 0 : index
    %120 = vector.load %arg7[%c0_41, %c0_42] : memref<1x32xf32, #tpu.memory_space<vmem>>, vector<1x32xf32>
    %121 = vector.broadcast %120 : vector<1x32xf32> to vector<5x32xf32>
    %122 = arith.addf %119, %121 : vector<5x32xf32>
    %123 = arith.addf %2, %122 : vector<5x32xf32>
    %c0_43 = arith.constant 0 : index
    %c0_44 = arith.constant 0 : index
    %124 = vector.load %arg8[%c0_43, %c0_44] : memref<1x32xf32, #tpu.memory_space<vmem>>, vector<1x32xf32>
    %c0_45 = arith.constant 0 : index
    %c0_46 = arith.constant 0 : index
    %125 = vector.load %arg9[%c0_45, %c0_46] : memref<1x32xf32, #tpu.memory_space<vmem>>, vector<1x32xf32>
    %cst_47 = arith.constant dense<0.000000e+00> : vector<5xf32>
    %126 = vector.multi_reduction <add>, %123, %cst_47 [1] : vector<5x32xf32> to vector<5xf32>
    %127 = vector.shape_cast %126 : vector<5xf32> to vector<5x1xf32>
    %cst_48 = arith.constant 3.200000e+01 : f32
    %128 = vector.broadcast %cst_48 : f32 to vector<5x1xf32>
    %129 = arith.divf %127, %128 : vector<5x1xf32>
    %130 = vector.broadcast %129 : vector<5x1xf32> to vector<5x32xf32>
    %131 = arith.subf %123, %130 : vector<5x32xf32>
    %132 = arith.mulf %131, %131 : vector<5x32xf32>
    %cst_49 = arith.constant dense<0.000000e+00> : vector<5xf32>
    %133 = vector.multi_reduction <add>, %132, %cst_49 [1] : vector<5x32xf32> to vector<5xf32>
    %134 = vector.shape_cast %133 : vector<5xf32> to vector<5x1xf32>
    %cst_50 = arith.constant 3.200000e+01 : f32
    %135 = vector.broadcast %cst_50 : f32 to vector<5x1xf32>
    %136 = arith.divf %134, %135 : vector<5x1xf32>
    %137 = vector.broadcast %129 : vector<5x1xf32> to vector<5x32xf32>
    %138 = arith.subf %123, %137 : vector<5x32xf32>
    %cst_51 = arith.constant 9.99999974E-6 : f32
    %139 = vector.broadcast %cst_51 : f32 to vector<5x1xf32>
    %140 = arith.addf %136, %139 : vector<5x1xf32>
    %141 = math.rsqrt %140 : vector<5x1xf32>
    %142 = vector.broadcast %141 : vector<5x1xf32> to vector<5x32xf32>
    %143 = arith.mulf %138, %142 : vector<5x32xf32>
    %144 = vector.broadcast %124 : vector<1x32xf32> to vector<5x32xf32>
    %145 = arith.mulf %143, %144 : vector<5x32xf32>
    %146 = vector.broadcast %125 : vector<1x32xf32> to vector<5x32xf32>
    %147 = arith.addf %145, %146 : vector<5x32xf32>
    %148 = arith.truncf %147 : vector<5x32xf32> to vector<5x32xbf16>
    %c0_52 = arith.constant 0 : index
    %c0_53 = arith.constant 0 : index
    %149 = vector.load %arg10[%c0_52, %c0_53] : memref<32x128xbf16, #tpu.memory_space<vmem>>, vector<32x128xbf16>
    %cst_54 = arith.constant dense<0.000000e+00> : vector<5x128xf32>
    %150 = tpu.matmul %148, %149, %cst_54 {dimension_numbers = #tpu.dot_dimension_numbers<[1], [0], [0], [1], [0, 0, 1, 1], [], []>} : vector<5x32xbf16>, vector<32x128xbf16>, vector<5x128xf32> -> vector<5x128xf32>
    %c0_55 = arith.constant 0 : index
    %c0_56 = arith.constant 0 : index
    %151 = vector.load %arg11[%c0_55, %c0_56] : memref<1x128xf32, #tpu.memory_space<vmem>>, vector<1x128xf32>
    %152 = vector.broadcast %151 : vector<1x128xf32> to vector<5x128xf32>
    %153 = arith.addf %150, %152 : vector<5x128xf32>
    %cst_57 = arith.constant 1.702000e+00 : f32
    %154 = vector.broadcast %cst_57 : f32 to vector<5x128xf32>
    %155 = arith.mulf %154, %153 : vector<5x128xf32>
    %156 = arith.negf %155 : vector<5x128xf32>
    %157 = math.exp %156 : vector<5x128xf32>
    %cst_58 = arith.constant 1.000000e+00 : f32
    %158 = vector.broadcast %cst_58 : f32 to vector<5x128xf32>
    %159 = arith.addf %158, %157 : vector<5x128xf32>
    %160 = arith.divf %158, %159 : vector<5x128xf32>
    %161 = arith.mulf %153, %160 : vector<5x128xf32>
    %162 = arith.truncf %161 : vector<5x128xf32> to vector<5x128xbf16>
    %c0_59 = arith.constant 0 : index
    %c0_60 = arith.constant 0 : index
    %163 = vector.load %arg12[%c0_59, %c0_60] : memref<128x32xbf16, #tpu.memory_space<vmem>>, vector<128x32xbf16>
    %cst_61 = arith.constant dense<0.000000e+00> : vector<5x32xf32>
    %164 = tpu.matmul %162, %163, %cst_61 {dimension_numbers = #tpu.dot_dimension_numbers<[1], [0], [0], [1], [0, 0, 1, 1], [], []>} : vector<5x128xbf16>, vector<128x32xbf16>, vector<5x32xf32> -> vector<5x32xf32>
    %c0_62 = arith.constant 0 : index
    %c0_63 = arith.constant 0 : index
    %165 = vector.load %arg13[%c0_62, %c0_63] : memref<1x32xf32, #tpu.memory_space<vmem>>, vector<1x32xf32>
    %166 = vector.broadcast %165 : vector<1x32xf32> to vector<5x32xf32>
    %167 = arith.addf %164, %166 : vector<5x32xf32>
    %168 = arith.addf %123, %167 : vector<5x32xf32>
    %169 = arith.truncf %168 : vector<5x32xf32> to vector<5x32xbf16>
    %c0_64 = arith.constant 0 : index
    %c0_65 = arith.constant 0 : index
    %c0_66 = arith.constant 0 : index
    %170 = vector.load %arg14[%c0_64, %c0_65, %c0_66] : memref<1x5x32xbf16, #tpu.memory_space<vmem>>, vector<1x5x32xbf16>
    %171 = vector.shape_cast %170 : vector<1x5x32xbf16> to vector<5x32xbf16>
    %172 = vector.shape_cast %169 : vector<5x32xbf16> to vector<1x5x32xbf16>
    tpu.vector_store %arg14[%c0_64, %c0_65, %c0_66], %172 {strides = array<i32>} : memref<1x5x32xbf16, #tpu.memory_space<vmem>>, vector<1x5x32xbf16>,
    return
  }
  func.func @transform_0(%arg0: i32) -> (i32, i32, i32) {
    %c0_i32 = arith.constant 0 : i32
    %c0_i32_0 = arith.constant 0 : i32
    %c0_i32_1 = arith.constant 0 : i32
    return %arg0, %c0_i32, %c0_i32_0 : i32, i32, i32
  }
  func.func @transform_1(%arg0: i32) -> (i32, i32) {
    %c0_i32 = arith.constant 0 : i32
    %c0_i32_0 = arith.constant 0 : i32
    %c0_i32_1 = arith.constant 0 : i32
    return %c0_i32, %c0_i32_0 : i32, i32
  }
  func.func @transform_2(%arg0: i32) -> (i32, i32) {
    %c0_i32 = arith.constant 0 : i32
    %c0_i32_0 = arith.constant 0 : i32
    %c0_i32_1 = arith.constant 0 : i32
    return %c0_i32, %c0_i32_0 : i32, i32
  }
  func.func @transform_3(%arg0: i32) -> (i32, i32) {
    %c0_i32 = arith.constant 0 : i32
    %c0_i32_0 = arith.constant 0 : i32
    %c0_i32_1 = arith.constant 0 : i32
    return %c0_i32, %c0_i32_0 : i32, i32
  }
  func.func @transform_4(%arg0: i32) -> (i32, i32) {
    %c0_i32 = arith.constant 0 : i32
    %c0_i32_0 = arith.constant 0 : i32
    %c0_i32_1 = arith.constant 0 : i32
    return %c0_i32, %c0_i32_0 : i32, i32
  }
  func.func @transform_5(%arg0: i32) -> (i32, i32) {
    %c0_i32 = arith.constant 0 : i32
    %c0_i32_0 = arith.constant 0 : i32
    %c0_i32_1 = arith.constant 0 : i32
    return %c0_i32, %c0_i32_0 : i32, i32
  }
  func.func @transform_6(%arg0: i32) -> (i32, i32) {
    %c0_i32 = arith.constant 0 : i32
    %c0_i32_0 = arith.constant 0 : i32
    %c0_i32_1 = arith.constant 0 : i32
    return %c0_i32, %c0_i32_0 : i32, i32
  }
  func.func @transform_7(%arg0: i32) -> (i32, i32) {
    %c0_i32 = arith.constant 0 : i32
    %c0_i32_0 = arith.constant 0 : i32
    %c0_i32_1 = arith.constant 0 : i32
    return %c0_i32, %c0_i32_0 : i32, i32
  }
  func.func @transform_8(%arg0: i32) -> (i32, i32) {
    %c0_i32 = arith.constant 0 : i32
    %c0_i32_0 = arith.constant 0 : i32
    %c0_i32_1 = arith.constant 0 : i32
    return %c0_i32, %c0_i32_0 : i32, i32
  }
  func.func @transform_9(%arg0: i32) -> (i32, i32) {
    %c0_i32 = arith.constant 0 : i32
    %c0_i32_0 = arith.constant 0 : i32
    %c0_i32_1 = arith.constant 0 : i32
    return %c0_i32, %c0_i32_0 : i32, i32
  }
  func.func @transform_10(%arg0: i32) -> (i32, i32) {
    %c0_i32 = arith.constant 0 : i32
    %c0_i32_0 = arith.constant 0 : i32
    %c0_i32_1 = arith.constant 0 : i32
    return %c0_i32, %c0_i32_0 : i32, i32
  }
  func.func @transform_11(%arg0: i32) -> (i32, i32) {
    %c0_i32 = arith.constant 0 : i32
    %c0_i32_0 = arith.constant 0 : i32
    %c0_i32_1 = arith.constant 0 : i32
    return %c0_i32, %c0_i32_0 : i32, i32
  }
  func.func @transform_12(%arg0: i32) -> (i32, i32) {
    %c0_i32 = arith.constant 0 : i32
    %c0_i32_0 = arith.constant 0 : i32
    %c0_i32_1 = arith.constant 0 : i32
    return %c0_i32, %c0_i32_0 : i32, i32
  }
  func.func @transform_13(%arg0: i32) -> (i32, i32, i32) {
    %c0_i32 = arith.constant 0 : i32
    %c0_i32_0 = arith.constant 0 : i32
    %c0_i32_1 = arith.constant 0 : i32
    return %arg0, %c0_i32, %c0_i32_0 : i32, i32, i32
  }
}

module attributes {stable_mosaic.version = 11 : i64} {
  func.func @_head_kernel(%arg0: memref<2x32xbf16, #tpu.memory_space<vmem>>, %arg1: memref<1x32xf32, #tpu.memory_space<vmem>>, %arg2: memref<1x32xf32, #tpu.memory_space<vmem>>, %arg3: memref<32x16xbf16, #tpu.memory_space<vmem>>, %arg4: memref<2x16xf32, #tpu.memory_space<vmem>>) attributes {dimension_semantics = [], scalar_prefetch = 0 : i64, scratch_operands = 0 : i64, tpu.core_type = #tpu.core_type<tc>} {
    %c0 = arith.constant 0 : index
    %c0_0 = arith.constant 0 : index
    %0 = vector.load %arg0[%c0, %c0_0] : memref<2x32xbf16, #tpu.memory_space<vmem>>, vector<2x32xbf16>
    %1 = arith.extf %0 : vector<2x32xbf16> to vector<2x32xf32>
    %c0_1 = arith.constant 0 : index
    %c0_2 = arith.constant 0 : index
    %2 = vector.load %arg1[%c0_1, %c0_2] : memref<1x32xf32, #tpu.memory_space<vmem>>, vector<1x32xf32>
    %c0_3 = arith.constant 0 : index
    %c0_4 = arith.constant 0 : index
    %3 = vector.load %arg2[%c0_3, %c0_4] : memref<1x32xf32, #tpu.memory_space<vmem>>, vector<1x32xf32>
    %cst = arith.constant dense<0.000000e+00> : vector<2xf32>
    %4 = vector.multi_reduction <add>, %1, %cst [1] : vector<2x32xf32> to vector<2xf32>
    %5 = vector.shape_cast %4 : vector<2xf32> to vector<2x1xf32>
    %cst_5 = arith.constant 3.200000e+01 : f32
    %6 = vector.broadcast %cst_5 : f32 to vector<2x1xf32>
    %7 = arith.divf %5, %6 : vector<2x1xf32>
    %8 = vector.broadcast %7 : vector<2x1xf32> to vector<2x32xf32>
    %9 = arith.subf %1, %8 : vector<2x32xf32>
    %10 = arith.mulf %9, %9 : vector<2x32xf32>
    %cst_6 = arith.constant dense<0.000000e+00> : vector<2xf32>
    %11 = vector.multi_reduction <add>, %10, %cst_6 [1] : vector<2x32xf32> to vector<2xf32>
    %12 = vector.shape_cast %11 : vector<2xf32> to vector<2x1xf32>
    %cst_7 = arith.constant 3.200000e+01 : f32
    %13 = vector.broadcast %cst_7 : f32 to vector<2x1xf32>
    %14 = arith.divf %12, %13 : vector<2x1xf32>
    %15 = vector.broadcast %7 : vector<2x1xf32> to vector<2x32xf32>
    %16 = arith.subf %1, %15 : vector<2x32xf32>
    %cst_8 = arith.constant 9.99999974E-6 : f32
    %17 = vector.broadcast %cst_8 : f32 to vector<2x1xf32>
    %18 = arith.addf %14, %17 : vector<2x1xf32>
    %19 = math.rsqrt %18 : vector<2x1xf32>
    %20 = vector.broadcast %19 : vector<2x1xf32> to vector<2x32xf32>
    %21 = arith.mulf %16, %20 : vector<2x32xf32>
    %22 = vector.broadcast %2 : vector<1x32xf32> to vector<2x32xf32>
    %23 = arith.mulf %21, %22 : vector<2x32xf32>
    %24 = vector.broadcast %3 : vector<1x32xf32> to vector<2x32xf32>
    %25 = arith.addf %23, %24 : vector<2x32xf32>
    %26 = arith.truncf %25 : vector<2x32xf32> to vector<2x32xbf16>
    %c0_9 = arith.constant 0 : index
    %c0_10 = arith.constant 0 : index
    %27 = vector.load %arg3[%c0_9, %c0_10] : memref<32x16xbf16, #tpu.memory_space<vmem>>, vector<32x16xbf16>
    %cst_11 = arith.constant dense<0.000000e+00> : vector<2x16xf32>
    %28 = tpu.matmul %26, %27, %cst_11 {dimension_numbers = #tpu.dot_dimension_numbers<[1], [0], [0], [1], [0, 0, 1, 1], [], []>} : vector<2x32xbf16>, vector<32x16xbf16>, vector<2x16xf32> -> vector<2x16xf32>
    %c0_12 = arith.constant 0 : index
    %c0_13 = arith.constant 0 : index
    %29 = vector.load %arg4[%c0_12, %c0_13] : memref<2x16xf32, #tpu.memory_space<vmem>>, vector<2x16xf32>
    tpu.vector_store %arg4[%c0_12, %c0_13], %28 {strides = array<i32>} : memref<2x16xf32, #tpu.memory_space<vmem>>, vector<2x16xf32>,
    return
  }
}

</mosaic_0001>

<bundles_post_ra>
// kernel: mask_vit_forward.7
= control target key start
LH: loop header
LB: loop body
LE: loop exit
PB: predicated region body
PF: predicated region fallthrough
CT: control target
= control target key end

     0   :  { %9 = vsyncpa [#allocation3], 0  ;;  %s429_s0 = inlined_call_operand.hbm [shape: bf16[2,32], index: 0, kind: input, shape index: {}]   ;;  %s430_s1 = inlined_call_operand.hbm [shape: f32[1,32], index: 1, kind: input, shape index: {}]   ;;  %s431_s2 = inlined_call_operand.hbm [shape: f32[1,32], index: 2, kind: input, shape index: {}]   ;;  %s432_s3 = inlined_call_operand.hbm [shape: bf16[32,16], index: 3, kind: input, shape index: {}]   ;;  %s433_s4 = inlined_call_operand.hbm [shape: f32[2,16], index: 4, kind: output, shape index: {}]  }
   0x1   :  { %10 = vsyncpa [#allocation6], 0 }
   0x2   :  { %11 = vsyncpa [#allocation9], 0 }
   0x3   :  { %12 = vsyncpa [#allocation4], 0  ;;  %s328_s15 = smov [#allocation5]   ;;  %s329_s17 = smov [#allocation2]  }
   0x4   :  { %s29_s16 = sshll.u32 %s328_s15, 4  ;;  %s19_s18 = sshll.u32 %s329_s17, 4  ;;  %s30_s16 = int_to_ptr.vmem [resolvable:$true] %s29_s16  ;;  %s20_s18 = int_to_ptr.vmem [resolvable:$true] %s19_s18 }
   0x5   :  { %s210_s21 = scalar_lea.hbm %s430_s1, 16 }
   0x6   :  { %p211_p0 = scmp.ne.s32.totalorder %s430_s1, %s210_s21  ;;  %p214_p1 = scmp.lt.u32.totalorder %s210_s21, %s430_s1 }
   0x8   :  { %p216_p2 = pnand %p214_p1, %p211_p0 }
   0xa   :  { %219 = shalt.err (!%p216_p2)
}
   0xb   :  { %s220_s26 = scalar_lea.vmem %s30_s16, 16  ;;  %s224_s27 = scalar_lea.vmem %s30_s16, 32 }
   0xc   :  { %p221_p3 = scmp.ne.s32.totalorder %s30_s16, %s220_s26  ;;  %p225_p4 = scmp.lt.s32.totalorder %s30_s16, %s30_s16 }
   0xd   :  { %p226_p5 = scmp.lt.s32.totalorder %s224_s27, %s220_s26 }
   0xf   :  { %p227_p6 = por %p226_p5, %p225_p4 }
  0x11   :  { %p228_p7 = pnand %p227_p6, %p221_p3 }
  0x13   :  { %231 = shalt.err (!%p228_p7)
}
  0x14   :  { %32 = dma.hbm_to_vmem [thread:$0]  %s430_s1, 16, %s30_s16, [#allocation6]  }
  0x15   :  { %s232_s6 = scalar_lea.hbm %s429_s0, 16 }
  0x16   :  { %p233_p8 = scmp.ne.s32.totalorder %s429_s0, %s232_s6  ;;  %p236_p9 = scmp.lt.u32.totalorder %s232_s6, %s429_s0 }
  0x18   :  { %p238_p10 = pnand %p236_p9, %p233_p8 }
  0x1a   :  { %241 = shalt.err (!%p238_p10)
}
  0x1b   :  { %s242_s11 = scalar_lea.vmem %s20_s18, 16  ;;  %s246_s12 = scalar_lea.vmem %s20_s18, 32 }
  0x1c   :  { %p243_p11 = scmp.ne.s32.totalorder %s20_s18, %s242_s11  ;;  %p247_p12 = scmp.lt.s32.totalorder %s20_s18, %s20_s18 }
  0x1d   :  { %p248_p13 = scmp.lt.s32.totalorder %s246_s12, %s242_s11 }
  0x1f   :  { %p249_p0 = por %p248_p13, %p247_p12 }
  0x21   :  { %p250_p1 = pnand %p249_p0, %p243_p11 }
  0x23   :  { %253 = shalt.err (!%p250_p1)
}
  0x24   :  { %22 = dma.hbm_to_vmem [thread:$0]  %s429_s0, 16, %s20_s18, [#allocation3]  }
  0x25   :  { %s330_s14 = smov [#allocation7]   ;;  %s331_s16 = smov [#allocation8]  }
  0x26   :  { %s39_s15 = sshll.u32 %s330_s14, 4  ;;  %s48_s17 = sshll.u32 %s331_s16, 4  ;;  %s40_s15 = int_to_ptr.vmem [resolvable:$true] %s39_s15  ;;  %s386_s17 = int_to_ptr.vmem [resolvable:$true] %s48_s17 }
  0x27   :  { %s254_s21 = scalar_lea.hbm %s431_s2, 16 }
  0x28   :  { %p255_p2 = scmp.ne.s32.totalorder %s431_s2, %s254_s21  ;;  %p258_p3 = scmp.lt.u32.totalorder %s254_s21, %s431_s2 }
  0x2a   :  { %p260_p4 = pnand %p258_p3, %p255_p2 }
  0x2c   :  { %263 = shalt.err (!%p260_p4)
}
  0x2d   :  { %s264_s0 = scalar_lea.vmem %s40_s15, 16  ;;  %s268_s18 = scalar_lea.vmem %s40_s15, 32 }
  0x2e   :  { %p265_p5 = scmp.ne.s32.totalorder %s40_s15, %s264_s0  ;;  %p269_p6 = scmp.lt.s32.totalorder %s40_s15, %s40_s15 }
  0x2f   :  { %p270_p7 = scmp.lt.s32.totalorder %s268_s18, %s264_s0 }
  0x31   :  { %p271_p8 = por %p270_p7, %p269_p6 }
  0x33   :  { %p272_p9 = pnand %p271_p8, %p265_p5 }
  0x35   :  { %275 = shalt.err (!%p272_p9)
}
  0x36   :  { %42 = dma.hbm_to_vmem [thread:$0]  %s431_s2, 16, %s40_s15, [#allocation6]  }
  0x37   :  { %s276_s30 = scalar_lea.hbm %s432_s3, 256 }
  0x38   :  { %p277_p10 = scmp.ne.s32.totalorder %s432_s3, %s276_s30  ;;  %p280_p11 = scmp.lt.u32.totalorder %s276_s30, %s432_s3 }
  0x3a   :  { %p282_p12 = pnand %p280_p11, %p277_p10 }
  0x3c   :  { %285 = shalt.err (!%p282_p12)
}
  0x3d   :  { %s286_s9 = scalar_lea.vmem %s386_s17, 256  ;;  %p291_p0 = scmp.lt.s32.totalorder %s386_s17, %s386_s17 }
  0x3e   :  { %p287_p13 = scmp.ne.s32.totalorder %s386_s17, %s286_s9  ;;  %p292_p1 = scmp.lt.s32.totalorder %s286_s9, %s286_s9 }
  0x40   :  { %p293_p2 = por %p292_p1, %p291_p0 }
  0x42   :  { %p294_p3 = pnand %p293_p2, %p287_p13 }
  0x44   :  { %297 = shalt.err (!%p294_p3)
}
  0x45   :  { %s332_s2 = smov 64   ;;  %s333_s10 = smov 4  }
  0x46   :  { %54 = dma.hbm_to_vmem [thread:$0]  %s432_s3, 256, %s386_s17, [#allocation9], %s332_s2, %s332_s2, %s333_s10  }
  0x47   :  { %320 = dma.done.wait [#allocation3], 16  }
  0x48   :  { %321 = vsyncadd [#allocation3], 4294967280 }
  0x49   :  { %322 = dma.done.wait [#allocation6], 32  }
  0x4a   :  { %323 = vsyncadd [#allocation6], 4294967264 }
  0x4b   :  { %324 = dma.done.wait [#allocation9], 256  }
  0x4c   :  { %325 = vsyncadd [#allocation9], 4294967040  ;;  %vm72_vm0 = vcmask 254976   ;;  %v68_v0 = vld [vmem:[#allocation2] sm:$0x1]  ;;  %v206_v8 = vld [vmem:[#allocation8] sm:$0xff]  }
  0x4d   :  { %v69_v1 = vunpack.c.l.bf16 %v68_v0  ;;  %v334_v9 = vmov 0.0   ;;  %v207_v10 = vld [vmem:[#allocation8 + $0x8] sm:$0xff]   ;;  %vm335_vm1 = vmmov 0   ;;  %v181_v15 = vld [vmem:[#allocation5] ss:$0 sm:$0xff]  ;;  %vm118_vm2 = vcmask 261120  }
  0x4e   :  { %189 = vmatprep.subr.bf16.mxu0 %v334_v9  ;;  %193 = vmatprep.mubr.msk.bf16.mxu0 %vm335_vm1, %v334_v9  ;;  %v182_v17 = vld [vmem:[#allocation7] ss:$0 sm:$0xff]  ;;  %s336_s3 = smov [#allocation10]   ;;  %vm162_vm3 = vcmask 123904  }
  0x4f   :  { %v73_v2 = vsel %vm72_vm0, %v69_v1, 0.0  ;;  %190 = vmatpush3.bf16.msra.mxu0 %v206_v8  ;;  %s170_s1 = sshll.u32 %s336_s3, 4  ;;  %s171_s1 = int_to_ptr.vmem [resolvable:$true] %s170_s1 }
  0x50   :  { %74 = vadd.xlane.f32.xlu0 %v73_v2  ;;  %191 = vmatprep.subr.bf16.mxu0 %v334_v9  ;;  %s298_s13 = scalar_lea.vmem %s171_s1, 32  ;;  %p303_p5 = scmp.lt.s32.totalorder %s171_s1, %s171_s1 }
  0x51   :  { %p299_p4 = scmp.ne.s32.totalorder %s171_s1, %s298_s13  ;;  %p304_p6 = scmp.lt.s32.totalorder %s298_s13, %s298_s13 }
  0x53   :  { %192 = vmatpush3.bf16.msra.mxu0 %v207_v10  ;;  %p305_p7 = por %p304_p6, %p303_p5 }
  0x55   :  { %p306_p8 = pnand %p305_p7, %p299_p4 }
  0xdd   :  { %v75_v3 = vpop.xlane.xlu0 %74 }
  0xde   :  { %v77_v4 = vmul.f32 0.03125, %v75_v3 }
  0xe0   :  { %v78_v5 = vsub.f32 %v69_v1, %v77_v4 }
  0xe2   :  { %v79_v6 = vmul.f32 %v78_v5, %v78_v5 }
  0xe4   :  { %v80_v7 = vsel %vm72_vm0, %v79_v6, 0.0 }
  0xe5   :  { %81 = vadd.xlane.f32.xlu0 %v80_v7 }
 0x172   :  { %v82_v11 = vpop.xlane.xlu0 %81 }
 0x173   :  { %v83_v12 = vmul.f32 0.03125, %v82_v11 }
 0x175   :  { %v84_v13 = vadd.f32 1e-05, %v83_v12 }
 0x177   :  { %208 = vrsqrt.f32 %v84_v13 }
 0x181   :  { %v209_v14 = vpop.eup %208 }
 0x182   :  { %v86_v16 = vmul.f32 %v209_v14, %v78_v5 }
 0x184   :  { %v93_v18 = vmul.f32 %v181_v15, %v86_v16 }
 0x186   :  { %v100_v19 = vadd.f32 %v182_v17, %v93_v18 }
 0x188   :  { %v101_v20 = vpack.c.bf16 %v100_v19, %v100_v19 }
 0x18a   :  { %194 = vmatmul.mubr.msk.bf16.vlgmr.msra.gmra.mrb[0].mxu0 %vm118_vm2, %v101_v20 }
 0x25d   :  { %v156_v21 = vpop.f32.mrb[0].mxu0 }
 0x25e   :  { %v195_v22 = vpop.f32.mrb[1].mxu0  ;;  %163 = vst.msk [vmem:[#allocation10] sm:$0x3] %vm162_vm3, %v156_v21 }
 0x25f   :  { %v159_v23 = vpop.f32.mrb[2].mxu0 }
 0x260   :  { %309 = shalt.err (!%p306_p8)
}
 0x261   :  { %s310_s16 = scalar_lea.hbm %s433_s4, 32 }
 0x262   :  { %p311_p9 = scmp.ne.s32.totalorder %s433_s4, %s310_s16  ;;  %p314_p10 = scmp.lt.u32.totalorder %s310_s16, %s433_s4 }
 0x264   :  { %p316_p11 = pnand %p314_p10, %p311_p9 }
 0x266   :  { %319 = shalt.err (!%p316_p11)
}
 0x267   :  { %173 = dma.vmem_to_hbm [thread:$0]  %s171_s1, 32, %s433_s4, [#allocation4]   ;;  %v196_v24 = vpop.f32.mrb[3].mxu0 }
 0x268   :  { %326 = dma.done.wait [#allocation4], 32  }
 0x269   :  { %327 = vsyncadd [#allocation4], 4294967264 }
 0x26a   :  { %177 = vsyncpa [#allocation3], 1 }
 0x26b   :  { %178 = vsyncpa [#allocation6], 1 }
 0x26c   :  { %179 = vsyncpa [#allocation9], 1 }
 0x26d   :  { %180 = vsyncpa [#allocation4], 1 }

// kernel: mask_vit_forward.4
= control target key start
LH: loop header
LB: loop body
LE: loop exit
PB: predicated region body
PF: predicated region fallthrough
CT: control target
= control target key end

     0   :  { %11 = vsyncpa [#allocation3], 0  ;;  %s1408_s0 = inlined_call_operand.hbm [shape: f32[2,4,192], index: 0, kind: input, shape index: {}]   ;;  %s1409_s1 = inlined_call_operand.hbm [shape: bf16[192,32], index: 1, kind: input, shape index: {}]   ;;  %s1410_s2 = inlined_call_operand.hbm [shape: f32[1,32], index: 2, kind: input, shape index: {}]   ;;  %s1411_s3 = inlined_call_operand.hbm [shape: f32[5,32], index: 3, kind: input, shape index: {}]   ;;  %s1412_s4 = inlined_call_operand.hbm [shape: f32[1,32], index: 4, kind: input, shape index: {}]   ;;  %s1413_s5 = inlined_call_operand.hbm [shape: f32[1,32], index: 5, kind: input, shape index: {}]   ;;  %s1414_s6 = inlined_call_operand.hbm [shape: bf16[2,5,32], index: 6, kind: output, shape index: {}]  }
   0x1   :  { %13 = vsyncpa [#allocation3 + $0x1], 0 }
   0x2   :  { %14 = vsyncpa [#allocation6], 0 }
   0x3   :  { %15 = vsyncpa [#allocation9], 0 }
   0x4   :  { %16 = vsyncpa [#allocation12], 0 }
   0x5   :  { %17 = vsyncpa [#allocation4], 0 }
   0x6   :  { %19 = vsyncpa [#allocation4 + $0x1], 0  ;;  %s1110_s21 = smov 0   ;;  %s1112_s22 = smov 0  }
   0x7   :  { %s1114_s23 = smov 0   ;;  %s1116_s24 = smov 0  }
   0x8 LB: > { %s1065_s25 = smov [#allocation5]   ;;  %s1131_s27 = sadd.s32 4294967295, %s1063_s24   ;;  %s1063_s24 = sphi %s1116_s24, %s1439_s24   ;;  %s1059_s23 = sphi %s1114_s23, %s1438_s23   ;;  %s1055_s22 = sphi %s1112_s22, %s1437_s22   ;;  %s1051_s21 = sphi %s1110_s21, %s1436_s21  }
   0x9   : > { %s199_s26 = sshll.u32 %s1065_s25, 4  ;;  %p662_p0 = scmp.ge.s32.totalorder %s1063_s24, 1  ;;  %s1136_s26 = int_to_ptr.vmem [resolvable:$true] %s199_s26 }
   0xa   : > { %p1415_p1 = scmp.eq.s32.totalorder %s1131_s27, 0  ;;  %p187_p2 = scmp.lt.s32.totalorder %s1063_s24, 3 }
   0xb   : > { %s1066_s29 = smov [#allocation8]   ;;  %s1067_s8 = smov [#allocation7]  }
   0xc   : > { %p1138_p3 = pnand %p662_p0, %p187_p2  ;;  %s224_s30 = sshll.u32 %s1066_s29, 4  ;;  %s1151_s30 = int_to_ptr.vmem [resolvable:$true] %s224_s30 }
   0xd   : > { %s213_s9 = sshll.u32 %s1067_s8, 4  ;;  %s815_s12 = scalar_lea.hbm %s1409_s1, 1536  ;;  %s1153_s9 = int_to_ptr.vmem [resolvable:$true] %s213_s9 }
   0xe   : > { %s1418_s28 = scalar_select %p1138_p3, 1, 0 }
   0xf   : > { %p724_p5 = pneg %p1138_p3  ;;  %p816_p7 = scmp.ne.s32.totalorder %s1409_s1, %s815_s12 }
  0x10   : > { %p822_p11 = scmp.lt.u32.totalorder %s815_s12, %s1409_s1 }
  0x11   : > { %p1147_p6 = pnand %p724_p5, %p1415_p1 }
  0x13   : > { %p1163_p8 = pneg %p1147_p6 }
  0x15   : > { %p818_p9 = pnand %p1163_p8, %p816_p7 }
  0x17   : > { %p819_p10 = pneg %p818_p9 }
  0x19   : > { %p824_p12 = pnand %p822_p11, %p819_p10 }
  0x1b   : > { %827 = shalt.err (!%p824_p12)
}
  0x1c   : > { %s828_s18 = scalar_lea.vmem %s1136_s26, 1536  ;;  %p836_p5 = scmp.lt.s32.totalorder %s1136_s26, %s1136_s26 }
  0x1d   : > { %p829_p13 = scmp.ne.s32.totalorder %s1136_s26, %s828_s18  ;;  %p837_p4 = scmp.lt.s32.totalorder %s828_s18, %s828_s18 }
  0x1f   : > { %p831_p0 = pnand %p829_p13, %p1163_p8  ;;  %p838_p7 = por %p837_p4, %p836_p5 }
  0x21   : > { %p832_p2 = pneg %p831_p0 }
  0x23   : > { %p839_p9 = pnand %p838_p7, %p832_p2 }
  0x25   : > { %842 = shalt.err (!%p839_p9)
}
  0x26   : > { %s1068_s19 = smov 64   ;;  %s1069_s20 = smov 4  }
  0x27   : > { %727 = dma.hbm_to_vmem [thread:$0]  (!%p1147_p6), %s1409_s1, 1536, %s1136_s26, [#allocation6], %s1068_s19, %s1068_s19, %s1069_s20  }
  0x28   : > { %s843_s11 = scalar_lea.hbm %s1411_s3, 128 }
  0x29   : > { %p844_p4 = scmp.ne.s32.totalorder %s1411_s3, %s843_s11  ;;  %p850_p12 = scmp.lt.u32.totalorder %s843_s11, %s1411_s3 }
  0x2b   : > { %p846_p10 = pnand %p844_p4, %p1163_p8 }
  0x2d   : > { %p847_p11 = pneg %p846_p10 }
  0x2f   : > { %p852_p13 = pnand %p850_p12, %p847_p11 }
  0x31   : > { %855 = shalt.err (!%p852_p13)
}
  0x32   : > { %s856_s26 = scalar_lea.vmem %s1151_s30, 128  ;;  %p864_p7 = scmp.lt.s32.totalorder %s1151_s30, %s1151_s30 }
  0x33   : > { %p857_p0 = scmp.ne.s32.totalorder %s1151_s30, %s856_s26  ;;  %p865_p9 = scmp.lt.s32.totalorder %s856_s26, %s856_s26 }
  0x35   : > { %p859_p2 = pnand %p857_p0, %p1163_p8  ;;  %p866_p4 = por %p865_p9, %p864_p7 }
  0x37   : > { %p860_p5 = pneg %p859_p2 }
  0x39   : > { %p867_p10 = pnand %p866_p4, %p860_p5 }
  0x3b   : > { %870 = shalt.err (!%p867_p10)
}
  0x3c   : > { %733 = dma.hbm_to_vmem [thread:$0]  (!%p1147_p6), %s1411_s3, 128, %s1151_s30, [#allocation9]  }
  0x3d   : > { %s871_s25 = scalar_lea.hbm %s1410_s2, 16 }
  0x3e   : > { %p872_p11 = scmp.ne.s32.totalorder %s1410_s2, %s871_s25  ;;  %p878_p0 = scmp.lt.u32.totalorder %s871_s25, %s1410_s2 }
  0x40   : > { %p874_p12 = pnand %p872_p11, %p1163_p8 }
  0x42   : > { %p875_p13 = pneg %p874_p12 }
  0x44   : > { %p880_p2 = pnand %p878_p0, %p875_p13 }
  0x46   : > { %883 = shalt.err (!%p880_p2)
}
  0x47   : > { %s884_s30 = scalar_lea.vmem %s1153_s9, 16  ;;  %s891_s12 = scalar_lea.vmem %s1153_s9, 32 }
  0x48   : > { %p885_p5 = scmp.ne.s32.totalorder %s1153_s9, %s884_s30  ;;  %p892_p4 = scmp.lt.s32.totalorder %s1153_s9, %s1153_s9 }
  0x49   : > { %p893_p10 = scmp.lt.s32.totalorder %s891_s12, %s884_s30 }
  0x4a   : > { %p887_p7 = pnand %p885_p5, %p1163_p8 }
  0x4b   : > { %p894_p11 = por %p893_p10, %p892_p4 }
  0x4c   : > { %p888_p9 = pneg %p887_p7 }
  0x4e   : > { %p895_p12 = pnand %p894_p11, %p888_p9 }
  0x50   : > { %898 = shalt.err (!%p895_p12)
}
  0x51   : > { %730 = dma.hbm_to_vmem [thread:$0]  (!%p1147_p6), %s1410_s2, 16, %s1153_s9, [#allocation6]  }
  0x52   : > { %s1070_s16 = smov [#allocation10]   ;;  %s1071_s17 = smov [#allocation11]  }
  0x53   : > { %s235_s26 = sshll.u32 %s1070_s16, 4  ;;  %s246_s18 = sshll.u32 %s1071_s17, 4  ;;  %s236_s26 = int_to_ptr.vmem [resolvable:$true] %s235_s26  ;;  %s247_s18 = int_to_ptr.vmem [resolvable:$true] %s246_s18 }
  0x54   : > { %s899_s25 = scalar_lea.hbm %s1412_s4, 16 }
  0x55   : > { %p900_p13 = scmp.ne.s32.totalorder %s1412_s4, %s899_s25  ;;  %p906_p5 = scmp.lt.u32.totalorder %s899_s25, %s1412_s4 }
  0x57   : > { %p902_p0 = pnand %p900_p13, %p1163_p8 }
  0x59   : > { %p903_p2 = pneg %p902_p0 }
  0x5b   : > { %p908_p7 = pnand %p906_p5, %p903_p2 }
  0x5d   : > { %911 = shalt.err (!%p908_p7)
}
  0x5e   : > { %s912_s9 = scalar_lea.vmem %s236_s26, 16  ;;  %s919_s30 = scalar_lea.vmem %s236_s26, 32 }
  0x5f   : > { %p913_p9 = scmp.ne.s32.totalorder %s236_s26, %s912_s9  ;;  %p920_p11 = scmp.lt.s32.totalorder %s236_s26, %s236_s26 }
  0x60   : > { %p921_p12 = scmp.lt.s32.totalorder %s919_s30, %s912_s9 }
  0x61   : > { %p915_p4 = pnand %p913_p9, %p1163_p8 }
  0x62   : > { %p922_p1 = por %p921_p12, %p920_p11 }
  0x63   : > { %p916_p10 = pneg %p915_p4 }
  0x65   : > { %p923_p3 = pnand %p922_p1, %p916_p10 }
  0x67   : > { %926 = shalt.err (!%p923_p3)
}
  0x68   : > { %736 = dma.hbm_to_vmem [thread:$0]  (!%p1147_p6), %s1412_s4, 16, %s236_s26, [#allocation9]  }
  0x69   : > { %s927_s17 = scalar_lea.hbm %s1413_s5, 16 }
  0x6a   : > { %p928_p13 = scmp.ne.s32.totalorder %s1413_s5, %s927_s17  ;;  %p934_p3 = scmp.lt.u32.totalorder %s927_s17, %s1413_s5 }
  0x6c   : > { %p930_p0 = pnand %p928_p13, %p1163_p8 }
  0x6e   : > { %p931_p1 = pneg %p930_p0 }
  0x70   : > { %p936_p2 = pnand %p934_p3, %p931_p1 }
  0x72   : > { %939 = shalt.err (!%p936_p2)
}
  0x73   : > { %s940_s8 = scalar_lea.vmem %s247_s18, 16  ;;  %s947_s26 = scalar_lea.vmem %s247_s18, 32 }
  0x74   : > { %p941_p5 = scmp.ne.s32.totalorder %s247_s18, %s940_s8  ;;  %p948_p4 = scmp.lt.s32.totalorder %s247_s18, %s247_s18 }
  0x75   : > { %p949_p10 = scmp.lt.s32.totalorder %s947_s26, %s940_s8 }
  0x76   : > { %p943_p7 = pnand %p941_p5, %p1163_p8 }
  0x77   : > { %p950_p11 = por %p949_p10, %p948_p4 }
  0x78   : > { %p944_p9 = pneg %p943_p7 }
  0x7a   : > { %p951_p12 = pnand %p950_p11, %p944_p9 }
  0x7c   : > { %954 = shalt.err (!%p951_p12)
}
  0x7d   : > { %739 = dma.hbm_to_vmem [thread:$0]  (!%p1147_p6), %s1413_s5, 16, %s247_s18, [#allocation12]  }
  0x7e   : > { %s661_s15 = sadd.s32 4294967294, %s1063_s24   ;;  %s1269_s7 = sadd.s32 1, %s1063_s24  }
  0x7f   : > { %s32_s9 = sadd.s32 1, %s1059_s23  ;;  %s29_s30 = ssub.s32 %s1063_s24, %s1269_s7 }
  0x80   : > { %p39_p8 = scmp.ne.s32.totalorder %s1059_s23, %s1055_s22  ;;  %p30_p13 = scmp.eq.s32.totalorder %s29_s30, 0 }
  0x81   : > { %p40_p0 = scmp.eq.s32.totalorder %s1063_s24, 0  ;;  %p45_p1 = scmp.ne.s32.totalorder %s1055_s22, %s1051_s21 }
  0x82   : > { %p174_p3 = scmp.eq.s32.totalorder %s1131_s27, 1  ;;  %p1421_p5 = scmp.eq.s32.totalorder %s1131_s27, 0 }
  0x83   : > { %s1281_s12 = scalar_select %p30_p13, %s1059_s23, %s32_s9  }
  0x84   : > { %p41_p2 = por %p40_p0, %p39_p8  ;;  %p1285_p7 = por %p1421_p5, %p45_p1 }
  0x85   : > { %p1289_p6 = por %p174_p3, %p39_p8  ;;  %p180_p9 = scmp.eq.s32.totalorder %s661_s15, 1 }
  0x86   : > { %p753_p4 = scmp.lt.s32.totalorder %s1063_s24, 2  ;;  %s257_s14 = sand.u32 1, %s1059_s23  }
  0x87   : > { %s1423_s18 = scalar_select %p1289_p6, 1, 0 }
  0x88   : > { %p1295_p10 = por %p180_p9, %p45_p1  ;;  %s669_s17 = sshll.u32 %s257_s14, 3 }
  0x89   : > { %s699_s19 = sshll.u32 %s1063_s24, 7  ;;  %s261_s8 = scalar_lea.vmem [#allocation2], %s669_s17 }
  0x8a   : > { %s1424_s16 = scalar_select %p1295_p10, 1, 0 }
  0x8b   : > { %s1303_s29 = scalar_lea.hbm %s1408_s0, %s699_s19  ;;  %s269_s26 = sshll.u32 %s261_s8, 4  ;;  %s1309_s26 = int_to_ptr.vmem [resolvable:$true] %s269_s26 }
  0x8c   : > { %p1305_p11 = pnand %p753_p4, %p41_p2  ;;  %s258_s11 = scalar_lea.sflag [#allocation3], %s257_s14 }
  0x8d   : > { %s955_s15 = scalar_lea.hbm %s1303_s29, 128  ;;  %s960_s17 = scalar_lea.hbm %s1408_s0, 256 }
  0x8e   : > { %p956_p12 = scmp.ne.s32.totalorder %s1303_s29, %s955_s15  ;;  %p957_p8 = pneg %p1305_p11 }
  0x8f   : > { %p961_p1 = scmp.lt.u32.totalorder %s1303_s29, %s1408_s0  ;;  %p962_p3 = scmp.lt.u32.totalorder %s960_s17, %s955_s15 }
  0x90   : > { %p958_p13 = pnand %p957_p8, %p956_p12  ;;  %p964_p5 = scmp.lt.u32.totalorder %s955_s15, %s1303_s29 }
  0x91   : > { %p963_p2 = por %p962_p3, %p961_p1 }
  0x92   : > { %p959_p0 = pneg %p958_p13 }
  0x93   : > { %p965_p9 = por %p964_p5, %p963_p2 }
  0x95   : > { %p966_p4 = pnand %p965_p9, %p959_p0 }
  0x97   : > { %969 = shalt.err (!%p966_p4)
}
  0x98   : > { %s970_s14 = scalar_lea.vmem %s1309_s26, 128  ;;  %s1072_s25 = smov [#allocation2]  }
  0x99   : > { %p971_p12 = scmp.ne.s32.totalorder %s1309_s26, %s970_s14  ;;  %s975_s8 = sshll.u32 %s1072_s25, 4  ;;  %s976_s8 = int_to_ptr.vmem [resolvable:$false] %s975_s8 }
  0x9a   : > { %s977_s9 = scalar_lea.vmem %s976_s8, 256  ;;  %p978_p6 = scmp.lt.s32.totalorder %s1309_s26, %s976_s8 }
  0x9b   : > { %p973_p13 = pnand %p971_p12, %p957_p8  ;;  %p979_p1 = scmp.lt.s32.totalorder %s977_s9, %s970_s14 }
  0x9d   : > { %p974_p10 = pneg %p973_p13  ;;  %p980_p3 = por %p979_p1, %p978_p6 }
  0x9f   : > { %p981_p2 = pnand %p980_p3, %p974_p10 }
  0xa1   : > { %984 = shalt.err (!%p981_p2)
}
  0xa2   : > { %743 = dma.hbm_to_vmem [thread:$0]  (!%p1305_p11), %s1303_s29, 128, %s1309_s26, %s258_s11  }
  0xa3   : > { %p1426_p0 = scmp.ne.s32.totalorder %s1418_s28, 0 }
  0xa4   : > { %s1339_s15 = sand.u32 (!%p1426_p0), 1, %s1055_s22  }
  0xa5   : > { %278 = sbr.rel (%p1426_p0) target bundleno = 778 (0x30a), region = 44  ;;  %s673_s30 = sshll.u32 (!%p1426_p0), %s1339_s15, 3 }
  0xa6   : > { %s281_s17 = scalar_lea.sflag (!%p1426_p0), [#allocation3], %s1339_s15  ;;  %s284_s19 = scalar_lea.vmem (!%p1426_p0), [#allocation2], %s673_s30 }
  0xac   : > { %1030 = dma.done.wait (%p1285_p7), %s281_s17, 128  }
  0xad   : > { %1032 = vsyncadd (%p1285_p7), %s281_s17, 4294967168  ;;  %p1427_p6 = scmp.eq.s32.totalorder %s1131_s27, 0 }
  0xaf   : > { %1034 = dma.done.wait (%p1427_p6), [#allocation6], 1552   ;;  %p1428_p10 = pmov %p1427_p6 }
  0xb0   : > { %p1429_p11 = pmov %p1427_p6 }
  0xb1   : > { %1036 = vsyncadd (%p1428_p10), [#allocation6], 4294965744 }
  0xb2   : > { %1038 = dma.done.wait (%p1429_p11), [#allocation9], 144   ;;  %p1430_p8 = pmov %p1427_p6 }
  0xb3   : > { %p1431_p5 = pmov %p1427_p6 }
  0xb4   : > { %1040 = vsyncadd (%p1430_p8), [#allocation9], 4294967152 }
  0xb5   : > { %1042 = dma.done.wait (%p1431_p5), [#allocation12], 16   ;;  %p1432_p9 = pmov %p1431_p5 }
  0xb6   : > { %v1073_v0 = vmov 0   ;;  %v800_v1 = vld [vmem:[#allocation5] sm:$0xff]   ;;  %v801_v2 = vld [vmem:[#allocation5 + $0x8] sm:$0xff]   ;;  %v802_v3 = vld [vmem:[#allocation5 + $0x10] sm:$0xff]   ;;  %vm442_vm0 = vcmask 523264   ;;  %vm489_vm1 = vcmask 1040384  }
  0xb7   : > { %1044 = vsyncadd (%p1432_p9), [#allocation12], 4294967280  ;;  %446 = vmatprep.subr.bf16.mxu0 %v1073_v0  ;;  %v803_v4 = vld [vmem:[#allocation5 + $0x18] sm:$0xff]   ;;  %v804_v7 = vld [vmem:[#allocation5 + $0x20] sm:$0xff]   ;;  %vm493_vm2 = vcmask 258048   ;;  %s679_s28 = sshll.u32 %s1339_s15, 2 }
  0xb8   : > { %447 = vmatpush1.bf16.msra.mxu0 %v800_v1  ;;  %v334_v5 = vld [vmem:[%s284_s19] sm:$0xff]  ;;  %v805_v9 = vld [vmem:[#allocation5 + $0x28] sm:$0xff]   ;;  %v808_v12 = vld [vmem:[#allocation5 + $0x40] sm:$0xff]   ;;  %vm523_vm3 = vcmask 256000   ;;  %vm524_vm4 = vsmask.f32 2304 }
  0xb9   : > { %448 = vmatprep.subr.bf16.mxu0 %v1073_v0  ;;  %v336_v6 = vcombine.high %v334_v5, %v334_v5  ;;  %v806_v10 = vld [vmem:[#allocation5 + $0x30] sm:$0xff]   ;;  %v807_v11 = vld [vmem:[#allocation5 + $0x38] sm:$0xff]   ;;  %v809_v13 = vld [vmem:[#allocation5 + $0x48] sm:$0xff]   ;;  %v338_v16 = vpack.c.bf16 %v334_v5, %v334_v5  ;;  %s696_s13 = sshll.u32 %s1131_s27, 6  ;;  %s332_s29 = scalar_lea.vmem [#allocation13], %s679_s28 }
  0xba   : > { %v810_v14 = vld [vmem:[#allocation5 + $0x50] sm:$0xff]   ;;  %v811_v15 = vld [vmem:[#allocation5 + $0x58] sm:$0xff]   ;;  %v364_v17 = vld [vmem:[#allocation8] sm:$0x1f]  ;;  %s543_s26 = sshll.u32 %s332_s29, 4  ;;  %s1364_s20 = scalar_lea.hbm %s1414_s6, %s696_s13  ;;  %s1366_s26 = int_to_ptr.vmem [resolvable:$true] %s543_s26 }
  0xbb   : > { %v339_v8 = vpack.c.bf16 %v336_v6, %v336_v6  ;;  %v440_v18 = vrot.slane %v364_v17, 1  ;;  %v365_v19 = vld [vmem:[#allocation7] sm:$0x1]  ;;  %v693_v38 = vld [vmem:[#allocation10] ss:$0 sm:$0xff]  ;;  %vm525_vm5 = vmand %vm523_vm3, %vm524_vm4  ;;  %s530_s14 = scalar_lea.sflag [#allocation4], %s1339_s15 }
  0xbc   : > { %449 = vmatpush1.bf16.msra.mxu0 %v801_v2  ;;  %v366_v21 = vadd.f32 %v365_v19, %v364_v17  ;;  %v694_v40 = vld [vmem:[#allocation11] ss:$0 sm:$0xff]  ;;  %v526_v43 = vld [vmem:[%s332_s29] sm:$0x7]  ;;  %s985_s25 = scalar_lea.vmem %s1366_s26, 64  ;;  %p1433_p4 = scmp.ne.s32.totalorder %s1423_s18, 0 }
  0xbd   : > { %450 = vmatprep.subr.bf16.mxu0 %v1073_v0  ;;  %692 = vmatprep.mubr.msk.bf16.mxu0 %vm442_vm0, %v339_v8  ;;  %p986_p7 = scmp.ne.s32.totalorder %s1366_s26, %s985_s25  ;;  %s1074_s27 = smov [#allocation13]  }
  0xbe   : > { %s989_s8 = sshll.u32 %s1074_s27, 4  ;;  %s990_s8 = int_to_ptr.vmem [resolvable:$false] %s989_s8 }
  0xbf   : > { %p987_p12 = pnand %p986_p7, %p1433_p4  ;;  %s991_s9 = scalar_lea.vmem %s990_s8, 128 }
  0xc0   : > { %451 = vmatpush1.bf16.msra.mxu0 %v802_v3  ;;  %p992_p1 = scmp.lt.s32.totalorder %s1366_s26, %s990_s8  ;;  %p993_p3 = scmp.lt.s32.totalorder %s991_s9, %s985_s25 }
  0xc1   : > { %452 = vmatprep.subr.bf16.mxu0 %v1073_v0  ;;  %p988_p13 = pneg %p987_p12 }
  0xc2   : > { %p994_p2 = por %p993_p3, %p992_p1 }
  0xc4   : > { %453 = vmatpush1.bf16.msra.mxu0 %v803_v4  ;;  %p995_p0 = pnand %p994_p2, %p988_p13 }
  0xc5   : > { %454 = vmatprep.subr.bf16.mxu0 %v1073_v0 }
  0xc8   : > { %455 = vmatpush1.bf16.msra.mxu0 %v804_v7 }
  0xc9   : > { %456 = vmatprep.subr.bf16.mxu0 %v1073_v0 }
  0xcc   : > { %457 = vmatpush1.bf16.msra.mxu0 %v805_v9 }
  0xcd   : > { %458 = vmatprep.subr.bf16.mxu0 %v1073_v0 }
  0xd0   : > { %459 = vmatpush1.bf16.msra.mxu0 %v806_v10 }
  0xd1   : > { %460 = vmatprep.subr.bf16.mxu0 %v1073_v0 }
  0xd4   : > { %461 = vmatpush1.bf16.msra.mxu0 %v807_v11 }
  0xd5   : > { %462 = vmatprep.subr.bf16.mxu0 %v1073_v0 }
  0xd8   : > { %463 = vmatpush1.bf16.msra.mxu0 %v808_v12 }
  0xd9   : > { %464 = vmatprep.subr.bf16.mxu0 %v1073_v0 }
  0xdc   : > { %465 = vmatpush1.bf16.msra.mxu0 %v809_v13 }
  0xdd   : > { %466 = vmatprep.subr.bf16.mxu0 %v1073_v0 }
  0xe0   : > { %467 = vmatpush1.bf16.msra.mxu0 %v810_v14 }
  0xe1   : > { %468 = vmatprep.subr.bf16.mxu0 %v1073_v0 }
  0xe4   : > { %469 = vmatpush1.bf16.msra.mxu0 %v811_v15 }
  0xe7   : > { %479 = vmatmul.mubr.bf16.vlgmr.msra.gmra.mrb[0].mxu0 %v338_v16 }
 0x1ba   : > { %v480_v20 = vpop.f32.mrb[0].mxu0 }
 0x1bb   : > { %v481_v22 = vadd.f32 %v480_v20, %v440_v18  ;;  %v482_v23 = vpop.f32.mrb[1].mxu0 }
 0x1bc   : > { %v483_v24 = vpop.f32.mrb[2].mxu0 }
 0x1bd   : > { %v487_v25 = vrot.slane %v481_v22, 7  ;;  %v484_v26 = vpop.f32.mrb[3].mxu0 }
 0x1bf   : > { %v490_v27 = vsel %vm489_vm1, %v366_v21, %v487_v25 }
 0x1c0   : > { %v494_v28 = vsel %vm493_vm2, %v490_v27, 0.0 }
 0x1c1   : > { %495 = vadd.xlane.f32.xlu0 %v494_v28 }
 0x24e   : > { %v496_v29 = vpop.xlane.xlu0 %495 }
 0x24f   : > { %v498_v30 = vmul.f32 0.03125, %v496_v29 }
 0x251   : > { %v499_v31 = vsub.f32 %v490_v27, %v498_v30 }
 0x253   : > { %v500_v32 = vmul.f32 %v499_v31, %v499_v31 }
 0x255   : > { %v501_v33 = vsel %vm493_vm2, %v500_v32, 0.0 }
 0x256   : > { %502 = vadd.xlane.f32.xlu0 %v501_v33 }
 0x2e3   : > { %v503_v34 = vpop.xlane.xlu0 %502 }
 0x2e4   : > { %v504_v35 = vmul.f32 0.03125, %v503_v34 }
 0x2e6   : > { %v505_v36 = vadd.f32 1e-05, %v504_v35 }
 0x2e8   : > { %813 = vrsqrt.f32 %v505_v36 }
 0x2f2   : > { %v814_v37 = vpop.eup %813 }
 0x2f3   : > { %v507_v39 = vmul.f32 %v814_v37, %v499_v31 }
 0x2f5   : > { %v514_v41 = vmul.f32 %v693_v38, %v507_v39 }
 0x2f7   : > { %v521_v42 = vadd.f32 %v694_v40, %v514_v41 }
 0x2f9   : > { %v522_v44 = vpack.c.bf16 %v521_v42, %v521_v42 }
 0x2fb   : > { %v527_v45 = vsel %vm525_vm5, %v522_v44, %v526_v43 }
 0x2fc   : > { %528 = vst [vmem:[%s332_s29] sm:$0x7] %v527_v45 }
 0x2fd   : > { %998 = shalt.err (!%p995_p0)
}
 0x2fe   : > { %s999_s15 = scalar_lea.hbm %s1364_s20, 64  ;;  %s1003_s19 = scalar_lea.hbm %s1414_s6, 128 }
 0x2ff   : > { %p1000_p6 = scmp.ne.s32.totalorder %s1364_s20, %s999_s15  ;;  %p1004_p8 = scmp.lt.u32.totalorder %s1364_s20, %s1414_s6 }
 0x300   : > { %p1005_p5 = scmp.lt.u32.totalorder %s1003_s19, %s999_s15  ;;  %p1007_p7 = scmp.lt.u32.totalorder %s999_s15, %s1364_s20 }
 0x301   : > { %p1001_p10 = pnand %p1000_p6, %p1433_p4 }
 0x302   : > { %p1006_p9 = por %p1005_p5, %p1004_p8 }
 0x303   : > { %p1002_p11 = pneg %p1001_p10 }
 0x304   : > { %p1008_p12 = por %p1007_p7, %p1006_p9 }
 0x306   : > { %p1009_p13 = pnand %p1008_p12, %p1002_p11 }
 0x308   : > { %1012 = shalt.err (!%p1009_p13)
}
 0x309   : > { %722 = dma.vmem_to_hbm [thread:$0]  (%p1433_p4), %s1366_s26, 64, %s1364_s20, %s530_s14  }
 0x30a PF: > { %s555_s29 = sand.u32 1, %s1051_s21   ;;  %p1434_p1 = scmp.ne.s32.totalorder %s1424_s16, 0 }
 0x30b   : > { %p1435_p3 = scmp.ge.s32.totalorder %s1063_s24, 2  ;;  %s556_s10 = scalar_lea.sflag [#allocation4], %s555_s29 }
 0x30d   : > { %p745_p2 = pnand %p1435_p3, %p1434_p1 }
 0x30f   : > { %1046 = dma.done.wait (!%p745_p2), %s556_s10, 64  }
 0x310   : > { %1048 = vsyncadd (!%p745_p2), %s556_s10, 4294967232  ;;  %p22_p0 = scmp.ge.s32.totalorder %s1269_s7, 4   ;;  %s1436_s21 = smov %s1055_s22 }
 0x311   : > { %s1437_s22 = smov %s1059_s23  ;;  %s1438_s23 = smov %s1281_s12 }
 0x312   : > { %s1439_s24 = smov %s1269_s7  ;;  %24 = sbr.rel (!%p22_p0) target bundleno = 8 (0x8), region = 109 }
 0x319   :  { %561 = vsyncpa [#allocation3], 1 }
 0x31a   :  { %563 = vsyncpa [#allocation3 + $0x1], 1 }
 0x31b   :  { %564 = vsyncpa [#allocation6], 1 }
 0x31c   :  { %565 = vsyncpa [#allocation9], 1 }
 0x31d   :  { %566 = vsyncpa [#allocation12], 1 }
 0x31e   :  { %567 = vsyncpa [#allocation4], 1 }
 0x31f   :  { %569 = vsyncpa [#allocation4 + $0x1], 1 }

// kernel: mask_vit_forward.5
= control target key start
LH: loop header
LB: loop body
LE: loop exit
PB: predicated region body
PF: predicated region fallthrough
CT: control target
= control target key end

     0   :  { %s3213_s0 = inlined_call_operand.hbm [shape: bf16[2,5,32], index: 0, kind: input, shape index: {}, may-alias: {0,13}]   ;;  %s3214_s1 = inlined_call_operand.hbm [shape: f32[1,32], index: 1, kind: input, shape index: {}]   ;;  %s3215_s2 = inlined_call_operand.hbm [shape: f32[1,32], index: 2, kind: input, shape index: {}]   ;;  %s3216_s3 = inlined_call_operand.hbm [shape: bf16[32,96], index: 3, kind: input, shape index: {}]   ;;  %s3217_s4 = inlined_call_operand.hbm [shape: f32[1,96], index: 4, kind: input, shape index: {}]   ;;  %s3218_s5 = inlined_call_operand.hbm [shape: bf16[32,32], index: 5, kind: input, shape index: {}]   ;;  %s3219_s6 = inlined_call_operand.hbm [shape: f32[1,32], index: 6, kind: input, shape index: {}]   ;;  %s3220_s7 = inlined_call_operand.hbm [shape: f32[1,32], index: 7, kind: input, shape index: {}]   ;;  %s3221_s8 = inlined_call_operand.hbm [shape: f32[1,32], index: 8, kind: input, shape index: {}]   ;;  %s3222_s9 = inlined_call_operand.hbm [shape: bf16[32,128], index: 9, kind: input, shape index: {}]   ;;  %s3223_s10 = inlined_call_operand.hbm [shape: f32[1,128], index: 10, kind: input, shape index: {}]   ;;  %s3224_s11 = inlined_call_operand.hbm [shape: bf16[128,32], index: 11, kind: input, shape index: {}]   ;;  %s3225_s12 = inlined_call_operand.hbm [shape: f32[1,32], index: 12, kind: input, shape index: {}]   ;;  %s3226_s13 = inlined_call_operand.hbm [shape: bf16[2,5,32], index: 13, kind: output, shape index: {}, may-alias: {0,13}]  }
   0x1   :  { %3236 = sst [smem:[#allocation35_spill]] %s3213_s0 }
   0x2   :  { %3237 = sst [smem:[#allocation36_spill]] %s3214_s1 }
   0x3   :  { %3238 = sst [smem:[#allocation37_spill]] %s3215_s2 }
   0x4   :  { %3239 = sst [smem:[#allocation38_spill]] %s3216_s3 }
   0x5   :  { %3240 = sst [smem:[#allocation39_spill]] %s3226_s13 }
   0x6   :  { %18 = vsyncpa [#allocation4], 0 }
   0x7   :  { %20 = vsyncpa [#allocation4 + $0x1], 0 }
   0x8   :  { %21 = vsyncpa [#allocation7], 0 }
   0x9   :  { %22 = vsyncpa [#allocation10], 0 }
   0xa   :  { %23 = vsyncpa [#allocation13], 0 }
   0xb   :  { %24 = vsyncpa [#allocation16], 0 }
   0xc   :  { %25 = vsyncpa [#allocation19], 0 }
   0xd   :  { %26 = vsyncpa [#allocation22], 0 }
   0xe   :  { %27 = vsyncpa [#allocation5], 0 }
   0xf   :  { %29 = vsyncpa [#allocation5 + $0x1], 0  ;;  %s2655_s25 = smov 0   ;;  %s2657_s26 = smov 0  }
  0x10   :  { %s2659_s27 = smov 0   ;;  %s2661_s28 = smov 0  }
  0x11 LB: > { %s2552_s29 = smov [#allocation6]   ;;  %s2676_s14 = sadd.s32 4294967295, %s2550_s28   ;;  %s2550_s28 = sphi %s2661_s28, %s3279_s28   ;;  %s2546_s27 = sphi %s2659_s27, %s3278_s27   ;;  %s2542_s26 = sphi %s2657_s26, %s3277_s26   ;;  %s2538_s25 = sphi %s2655_s25, %s3276_s25  }
  0x12   : > { %s357_s30 = sshll.u32 %s2552_s29, 4  ;;  %3241 = sst [smem:[#allocation33_spill]] %s2676_s14  ;;  %s2681_s30 = int_to_ptr.vmem [resolvable:$true] %s357_s30 }
  0x13   : > { %p1675_p0 = scmp.ge.s32.totalorder %s2550_s28, 1  ;;  %p3233_p1 = scmp.eq.s32.totalorder %s2676_s14, 0 }
  0x14   : > { %p344_p2 = scmp.lt.s32.totalorder %s2550_s28, 3  ;;  %s2553_s16 = smov [#allocation9]  }
  0x15   : > { %s378_s17 = sshll.u32 %s2553_s16, 4  ;;  %s2554_s19 = smov [#allocation12]   ;;  %s2690_s17 = int_to_ptr.vmem [resolvable:$true] %s378_s17 }
  0x16   : > { %p2683_p3 = pnand %p1675_p0, %p344_p2  ;;  %s402_s20 = sshll.u32 %s2554_s19, 4  ;;  %s2698_s20 = int_to_ptr.vmem [resolvable:$true] %s402_s20 }
  0x17   : > { %s3245_s1 = sld [smem:[#allocation36_spill]] }
  0x18   : > { %s3242_s15 = scalar_select %p2683_p3, 1, 0 }
  0x19   : > { %p1922_p5 = pneg %p2683_p3 }
  0x1a   : > { %3243 = sst [smem:[#allocation34_spill]] %s3242_s15 }
  0x1b   : > { %p2694_p6 = pnand %p1922_p5, %p3233_p1 }
  0x1d   : > { %s2094_s23 = scalar_lea.hbm %s3245_s1, 16  ;;  %p2708_p8 = pneg %p2694_p6 }
  0x1e   : > { %p2095_p7 = scmp.ne.s32.totalorder %s3245_s1, %s2094_s23  ;;  %p2101_p11 = scmp.lt.u32.totalorder %s2094_s23, %s3245_s1 }
  0x20   : > { %p2097_p9 = pnand %p2708_p8, %p2095_p7 }
  0x22   : > { %p2098_p10 = pneg %p2097_p9 }
  0x24   : > { %p2103_p12 = pnand %p2101_p11, %p2098_p10 }
  0x26   : > { %2106 = shalt.err (!%p2103_p12)
}
  0x27   : > { %s2107_s21 = scalar_lea.vmem %s2681_s30, 16  ;;  %s2114_s22 = scalar_lea.vmem %s2681_s30, 32 }
  0x28   : > { %p2108_p13 = scmp.ne.s32.totalorder %s2681_s30, %s2107_s21  ;;  %p2115_p5 = scmp.lt.s32.totalorder %s2681_s30, %s2681_s30 }
  0x29   : > { %p2116_p7 = scmp.lt.s32.totalorder %s2114_s22, %s2107_s21 }
  0x2a   : > { %p2110_p0 = pnand %p2108_p13, %p2708_p8 }
  0x2b   : > { %p2117_p9 = por %p2116_p7, %p2115_p5 }
  0x2c   : > { %p2111_p2 = pneg %p2110_p0 }
  0x2e   : > { %p2118_p4 = pnand %p2117_p9, %p2111_p2 }
  0x30   : > { %2121 = shalt.err (!%p2118_p4)
}
  0x31   : > { %1925 = dma.hbm_to_vmem [thread:$0]  (!%p2694_p6), %s3245_s1, 16, %s2681_s30, [#allocation7]  }
  0x32   : > { %s3247_s3 = sld [smem:[#allocation38_spill]] }
  0x38   : > { %s2122_s19 = scalar_lea.hbm %s3247_s3, 256 }
  0x39   : > { %p2123_p10 = scmp.ne.s32.totalorder %s3247_s3, %s2122_s19  ;;  %p2129_p4 = scmp.lt.u32.totalorder %s2122_s19, %s3247_s3 }
  0x3b   : > { %p2125_p11 = pnand %p2123_p10, %p2708_p8 }
  0x3d   : > { %p2126_p12 = pneg %p2125_p11 }
  0x3f   : > { %p2131_p13 = pnand %p2129_p4, %p2126_p12 }
  0x41   : > { %2134 = shalt.err (!%p2131_p13)
}
  0x42   : > { %s2135_s30 = scalar_lea.vmem %s2690_s17, 256  ;;  %p2143_p7 = scmp.lt.s32.totalorder %s2690_s17, %s2690_s17 }
  0x43   : > { %p2136_p0 = scmp.ne.s32.totalorder %s2690_s17, %s2135_s30  ;;  %p2144_p9 = scmp.lt.s32.totalorder %s2135_s30, %s2135_s30 }
  0x45   : > { %p2138_p2 = pnand %p2136_p0, %p2708_p8  ;;  %p2145_p10 = por %p2144_p9, %p2143_p7 }
  0x47   : > { %p2139_p5 = pneg %p2138_p2 }
  0x49   : > { %p2146_p11 = pnand %p2145_p10, %p2139_p5 }
  0x4b   : > { %2149 = shalt.err (!%p2146_p11)
}
  0x4c   : > { %s2555_s0 = smov 64   ;;  %s2556_s15 = smov 4  }
  0x4d   : > { %1931 = dma.hbm_to_vmem [thread:$0]  (!%p2694_p6), %s3247_s3, 256, %s2690_s17, [#allocation10], %s2555_s0, %s2555_s0, %s2556_s15  }
  0x4e   : > { %s2150_s19 = scalar_lea.hbm %s3218_s5, 256 }
  0x4f   : > { %p2151_p12 = scmp.ne.s32.totalorder %s3218_s5, %s2150_s19  ;;  %p2157_p0 = scmp.lt.u32.totalorder %s2150_s19, %s3218_s5 }
  0x51   : > { %p2153_p4 = pnand %p2151_p12, %p2708_p8 }
  0x53   : > { %p2154_p13 = pneg %p2153_p4 }
  0x55   : > { %p2159_p2 = pnand %p2157_p0, %p2154_p13 }
  0x57   : > { %2162 = shalt.err (!%p2159_p2)
}
  0x58   : > { %s2163_s17 = scalar_lea.vmem %s2698_s20, 256  ;;  %p2171_p10 = scmp.lt.s32.totalorder %s2698_s20, %s2698_s20 }
  0x59   : > { %p2164_p5 = scmp.ne.s32.totalorder %s2698_s20, %s2163_s17  ;;  %p2172_p11 = scmp.lt.s32.totalorder %s2163_s17, %s2163_s17 }
  0x5b   : > { %p2166_p7 = pnand %p2164_p5, %p2708_p8  ;;  %p2173_p12 = por %p2172_p11, %p2171_p10 }
  0x5d   : > { %p2167_p9 = pneg %p2166_p7 }
  0x5f   : > { %p2174_p4 = pnand %p2173_p12, %p2167_p9 }
  0x61   : > { %2177 = shalt.err (!%p2174_p4)
}
  0x62   : > { %1937 = dma.hbm_to_vmem [thread:$0]  (!%p2694_p6), %s3218_s5, 256, %s2698_s20, [#allocation13], %s2555_s0, %s2555_s0, %s2556_s15  }
  0x63   : > { %s2557_s23 = smov [#allocation15]   ;;  %s2558_s29 = smov [#allocation18]  }
  0x64   : > { %s427_s24 = sshll.u32 %s2557_s23, 4  ;;  %s448_s19 = sshll.u32 %s2558_s29, 4  ;;  %s428_s24 = int_to_ptr.vmem [resolvable:$true] %s427_s24  ;;  %s449_s19 = int_to_ptr.vmem [resolvable:$true] %s448_s19 }
  0x65   : > { %s2178_s30 = scalar_lea.hbm %s3220_s7, 16 }
  0x66   : > { %p2179_p13 = scmp.ne.s32.totalorder %s3220_s7, %s2178_s30  ;;  %p2185_p5 = scmp.lt.u32.totalorder %s2178_s30, %s3220_s7 }
  0x68   : > { %p2181_p0 = pnand %p2179_p13, %p2708_p8 }
  0x6a   : > { %p2182_p2 = pneg %p2181_p0 }
  0x6c   : > { %p2187_p7 = pnand %p2185_p5, %p2182_p2 }
  0x6e   : > { %2190 = shalt.err (!%p2187_p7)
}
  0x6f   : > { %s2191_s20 = scalar_lea.vmem %s428_s24, 16  ;;  %s2198_s13 = scalar_lea.vmem %s428_s24, 32 }
  0x70   : > { %p2192_p9 = scmp.ne.s32.totalorder %s428_s24, %s2191_s20  ;;  %p2199_p12 = scmp.lt.s32.totalorder %s428_s24, %s428_s24 }
  0x71   : > { %p2200_p4 = scmp.lt.s32.totalorder %s2198_s13, %s2191_s20 }
  0x72   : > { %p2194_p10 = pnand %p2192_p9, %p2708_p8 }
  0x73   : > { %p2201_p1 = por %p2200_p4, %p2199_p12 }
  0x74   : > { %p2195_p11 = pneg %p2194_p10 }
  0x76   : > { %p2202_p3 = pnand %p2201_p1, %p2195_p11 }
  0x78   : > { %2205 = shalt.err (!%p2202_p3)
}
  0x79   : > { %1943 = dma.hbm_to_vmem [thread:$0]  (!%p2694_p6), %s3220_s7, 16, %s428_s24, [#allocation16]  }
  0x7a   : > { %s2206_s21 = scalar_lea.hbm %s3222_s9, 256 }
  0x7b   : > { %p2207_p13 = scmp.ne.s32.totalorder %s3222_s9, %s2206_s21  ;;  %p2213_p3 = scmp.lt.u32.totalorder %s2206_s21, %s3222_s9 }
  0x7d   : > { %p2209_p0 = pnand %p2207_p13, %p2708_p8 }
  0x7f   : > { %p2210_p1 = pneg %p2209_p0 }
  0x81   : > { %p2215_p2 = pnand %p2213_p3, %p2210_p1 }
  0x83   : > { %2218 = shalt.err (!%p2215_p2)
}
  0x84   : > { %s2219_s20 = scalar_lea.vmem %s449_s19, 256  ;;  %p2227_p10 = scmp.lt.s32.totalorder %s449_s19, %s449_s19 }
  0x85   : > { %p2220_p5 = scmp.ne.s32.totalorder %s449_s19, %s2219_s20  ;;  %p2228_p11 = scmp.lt.s32.totalorder %s2219_s20, %s2219_s20 }
  0x87   : > { %p2222_p7 = pnand %p2220_p5, %p2708_p8  ;;  %p2229_p12 = por %p2228_p11, %p2227_p10 }
  0x89   : > { %p2223_p9 = pneg %p2222_p7 }
  0x8b   : > { %p2230_p4 = pnand %p2229_p12, %p2223_p9 }
  0x8d   : > { %2233 = shalt.err (!%p2230_p4)
}
  0x8e   : > { %1949 = dma.hbm_to_vmem [thread:$0]  (!%p2694_p6), %s3222_s9, 256, %s449_s19, [#allocation19], %s2555_s0, %s2555_s0, %s2556_s15  }
  0x8f   : > { %s2559_s3 = smov [#allocation21]   ;;  %s2560_s14 = smov [#allocation8]  }
  0x90   : > { %s472_s23 = sshll.u32 %s2559_s3, 4  ;;  %s368_s29 = sshll.u32 %s2560_s14, 4  ;;  %s473_s23 = int_to_ptr.vmem [resolvable:$true] %s472_s23  ;;  %s369_s29 = int_to_ptr.vmem [resolvable:$true] %s368_s29 }
  0x91   : > { %s2234_s30 = scalar_lea.hbm %s3224_s11, 1024 }
  0x92   : > { %p2235_p13 = scmp.ne.s32.totalorder %s3224_s11, %s2234_s30  ;;  %p2241_p3 = scmp.lt.u32.totalorder %s2234_s30, %s3224_s11 }
  0x94   : > { %p2237_p0 = pnand %p2235_p13, %p2708_p8 }
  0x96   : > { %p2238_p1 = pneg %p2237_p0 }
  0x98   : > { %p2243_p2 = pnand %p2241_p3, %p2238_p1 }
  0x9a   : > { %2246 = shalt.err (!%p2243_p2)
}
  0x9b   : > { %s2247_s19 = scalar_lea.vmem %s473_s23, 1024  ;;  %p2255_p10 = scmp.lt.s32.totalorder %s473_s23, %s473_s23 }
  0x9c   : > { %p2248_p5 = scmp.ne.s32.totalorder %s473_s23, %s2247_s19  ;;  %p2256_p11 = scmp.lt.s32.totalorder %s2247_s19, %s2247_s19 }
  0x9e   : > { %p2250_p7 = pnand %p2248_p5, %p2708_p8  ;;  %p2257_p12 = por %p2256_p11, %p2255_p10 }
  0xa0   : > { %p2251_p9 = pneg %p2250_p7 }
  0xa2   : > { %p2258_p4 = pnand %p2257_p12, %p2251_p9 }
  0xa4   : > { %2261 = shalt.err (!%p2258_p4)
}
  0xa5   : > { %1955 = dma.hbm_to_vmem [thread:$0]  (!%p2694_p6), %s3224_s11, 1024, %s473_s23, [#allocation22], %s2555_s0, %s2555_s0, %s2556_s15  }
  0xa6   : > { %s3248_s2 = sld [smem:[#allocation37_spill]] }
  0xac   : > { %s2262_s22 = scalar_lea.hbm %s3248_s2, 16 }
  0xad   : > { %p2263_p13 = scmp.ne.s32.totalorder %s3248_s2, %s2262_s22  ;;  %p2269_p3 = scmp.lt.u32.totalorder %s2262_s22, %s3248_s2 }
  0xaf   : > { %p2265_p0 = pnand %p2263_p13, %p2708_p8 }
  0xb1   : > { %p2266_p1 = pneg %p2265_p0 }
  0xb3   : > { %p2271_p2 = pnand %p2269_p3, %p2266_p1 }
  0xb5   : > { %2274 = shalt.err (!%p2271_p2)
}
  0xb6   : > { %s2275_s24 = scalar_lea.vmem %s369_s29, 16  ;;  %s2282_s0 = scalar_lea.vmem %s369_s29, 32 }
  0xb7   : > { %p2276_p5 = scmp.ne.s32.totalorder %s369_s29, %s2275_s24  ;;  %p2283_p10 = scmp.lt.s32.totalorder %s369_s29, %s369_s29 }
  0xb8   : > { %p2284_p11 = scmp.lt.s32.totalorder %s2282_s0, %s2275_s24 }
  0xb9   : > { %p2278_p7 = pnand %p2276_p5, %p2708_p8 }
  0xba   : > { %p2285_p12 = por %p2284_p11, %p2283_p10 }
  0xbb   : > { %p2279_p9 = pneg %p2278_p7 }
  0xbd   : > { %p2286_p4 = pnand %p2285_p12, %p2279_p9 }
  0xbf   : > { %2289 = shalt.err (!%p2286_p4)
}
  0xc0   : > { %1928 = dma.hbm_to_vmem [thread:$0]  (!%p2694_p6), %s3248_s2, 16, %s369_s29, [#allocation7]  }
  0xc1   : > { %s2561_s19 = smov [#allocation11]   ;;  %s2562_s3 = smov [#allocation14]  }
  0xc2   : > { %s392_s13 = sshll.u32 %s2561_s19, 4  ;;  %s416_s14 = sshll.u32 %s2562_s3, 4  ;;  %s393_s13 = int_to_ptr.vmem [resolvable:$true] %s392_s13  ;;  %s417_s14 = int_to_ptr.vmem [resolvable:$true] %s416_s14 }
  0xc3   : > { %s2290_s30 = scalar_lea.hbm %s3217_s4, 16 }
  0xc4   : > { %p2291_p13 = scmp.ne.s32.totalorder %s3217_s4, %s2290_s30  ;;  %p2297_p3 = scmp.lt.u32.totalorder %s2290_s30, %s3217_s4 }
  0xc6   : > { %p2293_p0 = pnand %p2291_p13, %p2708_p8 }
  0xc8   : > { %p2294_p1 = pneg %p2293_p0 }
  0xca   : > { %p2299_p2 = pnand %p2297_p3, %p2294_p1 }
  0xcc   : > { %2302 = shalt.err (!%p2299_p2)
}
  0xcd   : > { %s2303_s29 = scalar_lea.vmem %s393_s13, 16  ;;  %s2310_s0 = scalar_lea.vmem %s393_s13, 32 }
  0xce   : > { %p2304_p5 = scmp.ne.s32.totalorder %s393_s13, %s2303_s29  ;;  %p2311_p10 = scmp.lt.s32.totalorder %s393_s13, %s393_s13 }
  0xcf   : > { %p2312_p11 = scmp.lt.s32.totalorder %s2310_s0, %s2303_s29 }
  0xd0   : > { %p2306_p7 = pnand %p2304_p5, %p2708_p8 }
  0xd1   : > { %p2313_p12 = por %p2312_p11, %p2311_p10 }
  0xd2   : > { %p2307_p9 = pneg %p2306_p7 }
  0xd4   : > { %p2314_p4 = pnand %p2313_p12, %p2307_p9 }
  0xd6   : > { %2317 = shalt.err (!%p2314_p4)
}
  0xd7   : > { %1934 = dma.hbm_to_vmem [thread:$0]  (!%p2694_p6), %s3217_s4, 16, %s393_s13, [#allocation10]  }
  0xd8   : > { %s2318_s21 = scalar_lea.hbm %s3219_s6, 16 }
  0xd9   : > { %p2319_p13 = scmp.ne.s32.totalorder %s3219_s6, %s2318_s21  ;;  %p2325_p3 = scmp.lt.u32.totalorder %s2318_s21, %s3219_s6 }
  0xdb   : > { %p2321_p0 = pnand %p2319_p13, %p2708_p8 }
  0xdd   : > { %p2322_p1 = pneg %p2321_p0 }
  0xdf   : > { %p2327_p2 = pnand %p2325_p3, %p2322_p1 }
  0xe1   : > { %2330 = shalt.err (!%p2327_p2)
}
  0xe2   : > { %s2331_s20 = scalar_lea.vmem %s417_s14, 16  ;;  %s2338_s13 = scalar_lea.vmem %s417_s14, 32 }
  0xe3   : > { %p2332_p5 = scmp.ne.s32.totalorder %s417_s14, %s2331_s20  ;;  %p2339_p10 = scmp.lt.s32.totalorder %s417_s14, %s417_s14 }
  0xe4   : > { %p2340_p11 = scmp.lt.s32.totalorder %s2338_s13, %s2331_s20 }
  0xe5   : > { %p2334_p7 = pnand %p2332_p5, %p2708_p8 }
  0xe6   : > { %p2341_p12 = por %p2340_p11, %p2339_p10 }
  0xe7   : > { %p2335_p9 = pneg %p2334_p7 }
  0xe9   : > { %p2342_p4 = pnand %p2341_p12, %p2335_p9 }
  0xeb   : > { %2345 = shalt.err (!%p2342_p4)
}
  0xec   : > { %1940 = dma.hbm_to_vmem [thread:$0]  (!%p2694_p6), %s3219_s6, 16, %s417_s14, [#allocation13]  }
  0xed   : > { %s2563_s0 = smov [#allocation17]   ;;  %s2564_s23 = smov [#allocation20]  }
  0xee   : > { %s438_s15 = sshll.u32 %s2563_s0, 4  ;;  %s462_s19 = sshll.u32 %s2564_s23, 4  ;;  %s439_s15 = int_to_ptr.vmem [resolvable:$true] %s438_s15  ;;  %s463_s19 = int_to_ptr.vmem [resolvable:$true] %s462_s19 }
  0xef   : > { %s2346_s22 = scalar_lea.hbm %s3221_s8, 16 }
  0xf0   : > { %p2347_p13 = scmp.ne.s32.totalorder %s3221_s8, %s2346_s22  ;;  %p2353_p3 = scmp.lt.u32.totalorder %s2346_s22, %s3221_s8 }
  0xf2   : > { %p2349_p0 = pnand %p2347_p13, %p2708_p8 }
  0xf4   : > { %p2350_p1 = pneg %p2349_p0 }
  0xf6   : > { %p2355_p2 = pnand %p2353_p3, %p2350_p1 }
  0xf8   : > { %2358 = shalt.err (!%p2355_p2)
}
  0xf9   : > { %s2359_s14 = scalar_lea.vmem %s439_s15, 16  ;;  %s2366_s13 = scalar_lea.vmem %s439_s15, 32 }
  0xfa   : > { %p2360_p5 = scmp.ne.s32.totalorder %s439_s15, %s2359_s14  ;;  %p2367_p10 = scmp.lt.s32.totalorder %s439_s15, %s439_s15 }
  0xfb   : > { %p2368_p11 = scmp.lt.s32.totalorder %s2366_s13, %s2359_s14 }
  0xfc   : > { %p2362_p7 = pnand %p2360_p5, %p2708_p8 }
  0xfd   : > { %p2369_p12 = por %p2368_p11, %p2367_p10 }
  0xfe   : > { %p2363_p9 = pneg %p2362_p7 }
 0x100   : > { %p2370_p4 = pnand %p2369_p12, %p2363_p9 }
 0x102   : > { %2373 = shalt.err (!%p2370_p4)
}
 0x103   : > { %1946 = dma.hbm_to_vmem [thread:$0]  (!%p2694_p6), %s3221_s8, 16, %s439_s15, [#allocation16]  }
 0x104   : > { %s2374_s3 = scalar_lea.hbm %s3223_s10, 16 }
 0x105   : > { %p2375_p13 = scmp.ne.s32.totalorder %s3223_s10, %s2374_s3  ;;  %p2381_p3 = scmp.lt.u32.totalorder %s2374_s3, %s3223_s10 }
 0x107   : > { %p2377_p0 = pnand %p2375_p13, %p2708_p8 }
 0x109   : > { %p2378_p1 = pneg %p2377_p0 }
 0x10b   : > { %p2383_p2 = pnand %p2381_p3, %p2378_p1 }
 0x10d   : > { %2386 = shalt.err (!%p2383_p2)
}
 0x10e   : > { %s2387_s1 = scalar_lea.vmem %s463_s19, 16  ;;  %s2394_s15 = scalar_lea.vmem %s463_s19, 32 }
 0x10f   : > { %p2388_p5 = scmp.ne.s32.totalorder %s463_s19, %s2387_s1  ;;  %p2395_p10 = scmp.lt.s32.totalorder %s463_s19, %s463_s19 }
 0x110   : > { %p2396_p11 = scmp.lt.s32.totalorder %s2394_s15, %s2387_s1 }
 0x111   : > { %p2390_p7 = pnand %p2388_p5, %p2708_p8 }
 0x112   : > { %p2397_p12 = por %p2396_p11, %p2395_p10 }
 0x113   : > { %p2391_p9 = pneg %p2390_p7 }
 0x115   : > { %p2398_p4 = pnand %p2397_p12, %p2391_p9 }
 0x117   : > { %2401 = shalt.err (!%p2398_p4)
}
 0x118   : > { %1952 = dma.hbm_to_vmem [thread:$0]  (!%p2694_p6), %s3223_s10, 16, %s463_s19, [#allocation19]  }
 0x119   : > { %s2565_s13 = smov [#allocation23]   ;;  %s2402_s23 = scalar_lea.hbm %s3225_s12, 16 }
 0x11a   : > { %s486_s24 = sshll.u32 %s2565_s13, 4  ;;  %p2403_p13 = scmp.ne.s32.totalorder %s3225_s12, %s2402_s23  ;;  %s487_s24 = int_to_ptr.vmem [resolvable:$true] %s486_s24 }
 0x11b   : > { %p2409_p3 = scmp.lt.u32.totalorder %s2402_s23, %s3225_s12 }
 0x11c   : > { %p2405_p0 = pnand %p2403_p13, %p2708_p8 }
 0x11e   : > { %p2406_p1 = pneg %p2405_p0 }
 0x120   : > { %p2411_p2 = pnand %p2409_p3, %p2406_p1 }
 0x122   : > { %2414 = shalt.err (!%p2411_p2)
}
 0x123   : > { %s2415_s19 = scalar_lea.vmem %s487_s24, 16  ;;  %s2422_s17 = scalar_lea.vmem %s487_s24, 32 }
 0x124   : > { %p2416_p5 = scmp.ne.s32.totalorder %s487_s24, %s2415_s19  ;;  %p2423_p10 = scmp.lt.s32.totalorder %s487_s24, %s487_s24 }
 0x125   : > { %p2424_p11 = scmp.lt.s32.totalorder %s2422_s17, %s2415_s19 }
 0x126   : > { %p2418_p7 = pnand %p2416_p5, %p2708_p8 }
 0x127   : > { %p2425_p12 = por %p2424_p11, %p2423_p10 }
 0x128   : > { %p2419_p9 = pneg %p2418_p7 }
 0x12a   : > { %p2426_p4 = pnand %p2425_p12, %p2419_p9 }
 0x12c   : > { %2429 = shalt.err (!%p2426_p4)
}
 0x12d   : > { %s3249_s16 = sld [smem:[#allocation33_spill]]  ;;  %s1674_s20 = sadd.s32 4294967294, %s2550_s28  }
 0x12e   : > { %1958 = dma.hbm_to_vmem [thread:$0]  (!%p2694_p6), %s3225_s12, 16, %s487_s24, [#allocation22]  }
 0x12f   : > { %s2952_s18 = sadd.s32 1, %s2550_s28   ;;  %s42_s13 = sadd.s32 1, %s2546_s27 }
 0x130   : > { %s39_s14 = ssub.s32 %s2550_s28, %s2952_s18  ;;  %p49_p13 = scmp.ne.s32.totalorder %s2546_s27, %s2542_s26 }
 0x131   : > { %p40_p8 = scmp.eq.s32.totalorder %s39_s14, 0  ;;  %p50_p0 = scmp.eq.s32.totalorder %s2550_s28, 0 }
 0x132   : > { %p55_p1 = scmp.ne.s32.totalorder %s2542_s26, %s2538_s25  ;;  %p337_p7 = scmp.eq.s32.totalorder %s1674_s20, 1 }
 0x133   : > { %s2963_s29 = scalar_select %p40_p8, %s2546_s27, %s42_s13  }
 0x134   : > { %p2965_p3 = por %p50_p0, %p49_p13  ;;  %p3251_p2 = scmp.eq.s32.totalorder %s3249_s16, 0 }
 0x135   : > { %p331_p5 = scmp.eq.s32.totalorder %s3249_s16, 1  ;;  %p1979_p9 = scmp.lt.s32.totalorder %s2550_s28, 2 }
 0x136   : > { %p2971_p6 = por %p3251_p2, %p55_p1  ;;  %s497_s23 = sand.u32 1, %s2546_s27  }
 0x137   : > { %p2978_p10 = por %p331_p5, %p49_p13  ;;  %p2982_p11 = por %p337_p7, %p55_p1 }
 0x138   : > { %s1689_s22 = sshll.u32 %s497_s23, 2  ;;  %s1690_s30 = sshll.u32 %s2550_s28, 6 }
 0x139   : > { %s3253_s3 = scalar_select %p2978_p10, 1, 0 }
 0x13a   : > { %s3254_s21 = scalar_select %p2982_p11, 1, 0 }
 0x13b   : > { %s3255_s1 = sld [smem:[#allocation35_spill]]  ;;  %s501_s16 = scalar_lea.vmem [#allocation3], %s1689_s22 }
 0x13c   : > { %s508_s20 = sshll.u32 %s501_s16, 4  ;;  %p2996_p12 = pnand %p1979_p9, %p2965_p3  ;;  %s2992_s20 = int_to_ptr.vmem [resolvable:$true] %s508_s20 }
 0x13d   : > { %s498_s13 = scalar_lea.sflag [#allocation4], %s497_s23 }
 0x13e   : > { %p2432_p8 = pneg %p2996_p12 }
 0x141   : > { %s2990_s15 = scalar_lea.hbm %s3255_s1, %s1690_s30  ;;  %s2435_s19 = scalar_lea.hbm %s3255_s1, 128 }
 0x142   : > { %s2430_s2 = scalar_lea.hbm %s2990_s15, 64  ;;  %p2436_p1 = scmp.lt.u32.totalorder %s2990_s15, %s3255_s1 }
 0x143   : > { %p2431_p4 = scmp.ne.s32.totalorder %s2990_s15, %s2430_s2  ;;  %p2437_p3 = scmp.lt.u32.totalorder %s2435_s19, %s2430_s2 }
 0x144   : > { %p2439_p5 = scmp.lt.u32.totalorder %s2430_s2, %s2990_s15 }
 0x145   : > { %p2433_p13 = pnand %p2432_p8, %p2431_p4  ;;  %p2438_p2 = por %p2437_p3, %p2436_p1 }
 0x147   : > { %p2434_p0 = pneg %p2433_p13  ;;  %p2440_p7 = por %p2439_p5, %p2438_p2 }
 0x149   : > { %p2441_p9 = pnand %p2440_p7, %p2434_p0 }
 0x14b   : > { %2444 = shalt.err (!%p2441_p9)
}
 0x14c   : > { %s2445_s23 = scalar_lea.vmem %s2992_s20, 64  ;;  %s2566_s16 = smov [#allocation3]  }
 0x14d   : > { %p2446_p4 = scmp.ne.s32.totalorder %s2992_s20, %s2445_s23  ;;  %s2450_s22 = sshll.u32 %s2566_s16, 4  ;;  %s2451_s22 = int_to_ptr.vmem [resolvable:$false] %s2450_s22 }
 0x14e   : > { %s2452_s30 = scalar_lea.vmem %s2451_s22, 128  ;;  %p2453_p10 = scmp.lt.s32.totalorder %s2992_s20, %s2451_s22 }
 0x14f   : > { %p2448_p13 = pnand %p2446_p4, %p2432_p8  ;;  %p2454_p1 = scmp.lt.s32.totalorder %s2452_s30, %s2445_s23 }
 0x151   : > { %p2449_p11 = pneg %p2448_p13  ;;  %p2455_p3 = por %p2454_p1, %p2453_p10 }
 0x153   : > { %p2456_p2 = pnand %p2455_p3, %p2449_p11 }
 0x155   : > { %2459 = shalt.err (!%p2456_p2)
}
 0x156   : > { %1962 = dma.hbm_to_vmem [thread:$0]  (!%p2996_p12), %s2990_s15, 64, %s2992_s20, %s498_s13  }
 0x157   : > { %s3257_s2 = sld [smem:[#allocation34_spill]] }
 0x15d   : > { %p3258_p0 = scmp.ne.s32.totalorder %s3257_s2, 0 }
 0x15e   : > { %s3028_s19 = sand.u32 (!%p3258_p0), 1, %s2542_s26  }
 0x15f   : > { %517 = sbr.rel (%p3258_p0) target bundleno = 2823 (0xb07), region = 72  ;;  %s1692_s0 = sshll.u32 (!%p3258_p0), %s3028_s19, 2 }
 0x160   : > { %s520_s17 = scalar_lea.sflag (!%p3258_p0), [#allocation4], %s3028_s19  ;;  %s523_s23 = scalar_lea.vmem (!%p3258_p0), [#allocation3], %s1692_s0 }
 0x166   : > { %2505 = dma.done.wait (%p2971_p6), %s520_s17, 64  }
 0x167   : > { %2507 = vsyncadd (%p2971_p6), %s520_s17, 4294967232  ;;  %s3259_s15 = sld [smem:[#allocation33_spill]] }
 0x16d   : > { %p3260_p10 = scmp.eq.s32.totalorder %s3259_s15, 0 }
 0x16f   : > { %2509 = dma.done.wait (%p3260_p10), [#allocation7], 32   ;;  %p3261_p11 = pmov %p3260_p10 }
 0x170   : > { %p3262_p12 = pmov %p3260_p10 }
 0x171   : > { %2511 = vsyncadd (%p3261_p11), [#allocation7], 4294967264 }
 0x172   : > { %2513 = dma.done.wait (%p3262_p12), [#allocation10], 272   ;;  %p3263_p8 = pmov %p3260_p10 }
 0x174   : > { %2515 = vsyncadd (%p3263_p8), [#allocation10], 4294967024  ;;  %p3264_p5 = pmov %p3263_p8 }
 0x176   : > { %2517 = dma.done.wait (%p3264_p5), [#allocation13], 272   ;;  %p3265_p7 = pmov %p3264_p5 }
 0x177   : > { %p3266_p6 = pmov %p3264_p5 }
 0x178   : > { %2519 = vsyncadd (%p3265_p7), [#allocation13], 4294967024 }
 0x179   : > { %2521 = dma.done.wait (%p3266_p6), [#allocation16], 32   ;;  %p3267_p9 = pmov %p3264_p5 }
 0x17a   : > { %p3268_p4 = pmov %p3264_p5 }
 0x17b   : > { %2523 = vsyncadd (%p3267_p9), [#allocation16], 4294967264 }
 0x17c   : > { %2525 = dma.done.wait (%p3268_p4), [#allocation19], 272   ;;  %p3269_p13 = pmov %p3268_p4 }
 0x17d   : > { %p3270_p1 = pmov %p3268_p4 }
 0x17e   : > { %2527 = vsyncadd (%p3269_p13), [#allocation19], 4294967024 }
 0x17f   : > { %2529 = dma.done.wait (%p3270_p1), [#allocation22], 1040   ;;  %p3271_p3 = pmov %p3270_p1 }
 0x180   : > { %vm619_vm0 = vcmask 258048   ;;  %v615_v0 = vld [vmem:[%s523_s23] sm:$0x7]  ;;  %v2056_v8 = vld [vmem:[#allocation9] sm:$0xff]   ;;  %v2567_v9 = vmov 0.0   ;;  %vm2568_vm1 = vmmov 0  }
 0x181   : > { %2531 = vsyncadd (%p3271_p3), [#allocation22], 4294966256  ;;  %v3062_v1 = vunpack.c.l.bf16 %v615_v0  ;;  %1778 = vmatprep.subr.bf16.mxu0 %v2567_v9  ;;  %1782 = vmatprep.mubr.msk.bf16.mxu0 %vm2568_vm1, %v2567_v9  ;;  %v2057_v10 = vld [vmem:[#allocation9 + $0x8] sm:$0xff]   ;;  %v1706_v15 = vld [vmem:[#allocation6] ss:$0 sm:$0xff]  ;;  %vm672_vm2 = vcmask 261120  }
 0x182   : > { %1779 = vmatpush3.bf16.msra.mxu0 %v2056_v8  ;;  %1798 = vmatprep.subr.bf16.mxu1 %v2567_v9  ;;  %v1707_v17 = vld [vmem:[#allocation8] ss:$0 sm:$0xff]  ;;  %v1708_v21 = vld [vmem:[#allocation11] ss:$0 sm:$0xff]  ;;  %s2569_s24 = smov 120   ;;  %s2570_s20 = smov 96  }
 0x183   : > { %v620_v2 = vsel %vm619_vm0, %v3062_v1, 0.0  ;;  %1780 = vmatprep.subr.bf16.mxu0 %v2567_v9  ;;  %1800 = vmatprep.mubr.msk.bf16.mxu1 %vm2568_vm1, %v2567_v9  ;;  %s2571_s14 = smov 88   ;;  %s2572_s13 = smov 80   ;;  %vm720_vm3 = vcmask 64512   ;;  %vm767_vm4 = vcmask 36864   ;;  %vm785_vm5 = vcmask 1041408  }
 0x184   : > { %621 = vadd.xlane.f32.xlu0 %v620_v2  ;;  %s2573_s16 = smov 112   ;;  %s2574_s22 = smov 72   ;;  %vm786_vm6 = vcmask 1042432   ;;  %v2580_v59 = vmov 65535   ;;  %vm781_vm7 = vcmask 39936   ;;  %vm833_vm8 = vcmask 61440  }
 0x185   : > { %s2575_s30 = smov 104   ;;  %s2576_s2 = smov 64   ;;  %v787_v60 = vsel %vm785_vm5, 4294967295, %v2580_v59  ;;  %vm949_vm9 = vcmask 127040   ;;  %vm1065_vm10 = vcmask 192640   ;;  %vm1181_vm11 = vcmask 258240  }
 0x186   : > { %1781 = vmatpush3.bf16.msra.mxu0 %v2057_v10  ;;  %s2577_s17 = smov 56   ;;  %s2578_s23 = smov 48   ;;  %v788_v63 = vsel %vm786_vm6, %v787_v60, 0  ;;  %vm1470_vm12 = vcmask 256000   ;;  %vm1471_vm13 = vsmask.f32 2304 }
 0x187   : > { %1786 = vmatprep.subr.bf16.mxu0 %v2567_v9  ;;  %vm1472_vm14 = vmand %vm1470_vm12, %vm1471_vm13  ;;  %p3273_p0 = scmp.ne.s32.totalorder %s3253_s3, 0 }
 0x211   : > { %v622_v3 = vpop.xlane.xlu0 %621 }
 0x212   : > { %v624_v4 = vmul.f32 0.03125, %v622_v3 }
 0x214   : > { %v625_v5 = vsub.f32 %v3062_v1, %v624_v4 }
 0x216   : > { %v626_v6 = vmul.f32 %v625_v5, %v625_v5 }
 0x218   : > { %v627_v7 = vsel %vm619_vm0, %v626_v6, 0.0 }
 0x219   : > { %628 = vadd.xlane.f32.xlu0 %v627_v7 }
 0x2a6   : > { %v629_v11 = vpop.xlane.xlu0 %628 }
 0x2a7   : > { %v630_v12 = vmul.f32 0.03125, %v629_v11 }
 0x2a9   : > { %v631_v13 = vadd.f32 1e-05, %v630_v12 }
 0x2ab   : > { %2070 = vrsqrt.f32 %v631_v13 }
 0x2b5   : > { %v2071_v14 = vpop.eup %2070 }
 0x2b6   : > { %v633_v16 = vmul.f32 %v2071_v14, %v625_v5 }
 0x2b8   : > { %v640_v18 = vmul.f32 %v1706_v15, %v633_v16 }
 0x2ba   : > { %v647_v19 = vadd.f32 %v1707_v17, %v640_v18 }
 0x2bc   : > { %v648_v20 = vpack.c.bf16 %v647_v19, %v647_v19 }
 0x2be   : > { %1783 = vmatmul.mubr.msk.bf16.vlgmr.msra.gmra.mrb[0].mxu0 %vm672_vm2, %v648_v20 }
 0x2bf   : > { %1788 = vmatprep.mubr.msk.bf16.mxu0 %vm2568_vm1, %v2567_v9 }
 0x391   : > { %v710_v22 = vpop.f32.mrb[0].mxu0 }
 0x392   : > { %v711_v23 = vadd.f32 %v1708_v21, %v710_v22  ;;  %v1784_v24 = vpop.f32.mrb[1].mxu0 }
 0x393   : > { %v713_v25 = vpop.f32.mrb[2].mxu0 }
 0x394   : > { %v3079_v26 = vpack.c.bf16 %v711_v23, %v711_v23  ;;  %v1785_v27 = vpop.f32.mrb[3].mxu0 }
 0x396   : > { %835 = vrot.lane.b32.xlu0 %v3079_v26, %s2569_s24  ;;  %718 = vrot.lane.b32.xlu1 %v3079_v26, %s2570_s20  ;;  %s2579_s24 = smov 40   ;;  %s2581_s20 = smov 8  }
 0x39a   : > { %837 = vrot.lane.b32.xlu1 %v3079_v26, %s2571_s14  ;;  %s2582_s14 = smov 16  }
 0x39e   : > { %953 = vrot.lane.b32.xlu1 %v3079_v26, %s2572_s13  ;;  %s2583_s13 = smov 24  }
 0x3a2   : > { %951 = vrot.lane.b32.xlu1 %v3079_v26, %s2573_s16  ;;  %s1741_s16 = sshll.u32 %s3259_s15, 6 }
 0x3a6   : > { %1069 = vrot.lane.b32.xlu1 %v3079_v26, %s2574_s22  ;;  %s613_s22 = scalar_lea.vmem [#allocation24], %s1692_s0  ;;  %s2584_s0 = smov [#allocation24]  }
 0x3aa   : > { %1067 = vrot.lane.b32.xlu1 %v3079_v26, %s2575_s30  ;;  %s1490_s30 = sshll.u32 %s613_s22, 4  ;;  %s3171_s30 = int_to_ptr.vmem [resolvable:$true] %s1490_s30 }
 0x3ab   : > { %s2460_s15 = scalar_lea.vmem %s3171_s30, 64 }
 0x3ac   : > { %p2461_p2 = scmp.ne.s32.totalorder %s3171_s30, %s2460_s15 }
 0x3ae   : > { %p2462_p10 = pnand %p2461_p2, %p3273_p0 }
 0x3b0   : > { %p2463_p11 = pneg %p2462_p10 }
 0x408   : > { %v719_v28 = vpop.permute.xlu1 %718  ;;  %v836_v33 = vpop.permute.xlu0 %835 }
 0x409   : > { %v725_v29 = vsel %vm720_vm3, %v719_v28, 0 }
 0x40a   : > { %1787 = vmatpush3.bf16.xpose.msra.mxu0 %v725_v29 }
 0x40b   : > { %1792 = vmatprep.subr.bf16.mxu0 %v2567_v9 }
 0x40c   : > { %v838_v30 = vpop.permute.xlu1 %837 }
 0x40d   : > { %v843_v31 = vsel %vm720_vm3, %v838_v30, 0 }
 0x40e   : > { %1799 = vmatpush3.bf16.xpose.msra.mxu1 %v843_v31 }
 0x40f   : > { %1810 = vmatprep.subr.bf16.mxu1 %v2567_v9 }
 0x410   : > { %v954_v32 = vpop.permute.xlu1 %953 }
 0x411   : > { %1789 = vmatmul.mubr.msk.bf16.vlgmr.msra.gmra.mrb[4].mxu0 %vm720_vm3, %v3079_v26  ;;  %v959_v35 = vsel %vm720_vm3, %v954_v32, 0 }
 0x412   : > { %1794 = vmatprep.mubr.msk.bf16.mxu0 %vm2568_vm1, %v2567_v9 }
 0x414   : > { %v952_v34 = vpop.permute.xlu1 %951 }
 0x415   : > { %1801 = vmatmul.mubr.msk.bf16.vlgmr.msra.gmra.mrb[0].mxu1 %vm720_vm3, %v836_v33 }
 0x416   : > { %1811 = vmatpush3.bf16.xpose.msra.mxu1 %v959_v35  ;;  %1812 = vmatprep.mubr.msk.bf16.mxu1 %vm2568_vm1, %v2567_v9 }
 0x417   : > { %1822 = vmatprep.subr.bf16.mxu1 %v2567_v9 }
 0x418   : > { %v1070_v36 = vpop.permute.xlu1 %1069 }
 0x419   : > { %v1075_v37 = vsel %vm720_vm3, %v1070_v36, 0 }
 0x41c   : > { %v1068_v38 = vpop.permute.xlu1 %1067 }
 0x41d   : > { %1813 = vmatmul.mubr.msk.bf16.vlgmr.msra.gmra.mrb[4].mxu1 %vm720_vm3, %v952_v34 }
 0x41e   : > { %1823 = vmatpush3.bf16.xpose.msra.mxu1 %v1075_v37  ;;  %1824 = vmatprep.mubr.msk.bf16.mxu1 %vm2568_vm1, %v2567_v9 }
 0x41f   : > { %1834 = vmatprep.subr.bf16.mxu1 %v2567_v9 }
 0x425   : > { %1825 = vmatmul.mubr.msk.bf16.vlgmr.msra.gmra.mrb[8].mxu1 %vm720_vm3, %v1068_v38 }
 0x426   : > { %1838 = vmatprep.mubr.msk.bf16.mxu1 %vm2568_vm1, %v2567_v9 }
 0x4e4   : > { %v761_v39 = vpop.f32.mrb[4].mxu0 }
 0x4e5   : > { %v1790_v40 = vpop.f32.mrb[5].mxu0  ;;  %v768_v41 = vsel %vm767_vm4, %v761_v39, -inf }
 0x4e6   : > { %769 = vmax.xlane.f32.xlu1 %v768_v41  ;;  %v764_v42 = vpop.f32.mrb[6].mxu0 }
 0x4e7   : > { %v1791_v43 = vpop.f32.mrb[7].mxu0 }
 0x4e8   : > { %v879_v44 = vpop.f32.mrb[0].mxu1 }
 0x4e9   : > { %v1802_v45 = vpop.f32.mrb[1].mxu1  ;;  %v885_v46 = vsel %vm767_vm4, %v879_v44, -inf }
 0x4ea   : > { %886 = vmax.xlane.f32.xlu0 %v885_v46  ;;  %v882_v47 = vpop.f32.mrb[2].mxu1 }
 0x4eb   : > { %v1803_v48 = vpop.f32.mrb[3].mxu1 }
 0x4ec   : > { %v2058_v48 = vld [vmem:[#allocation12] sm:$0xff]  }
 0x4ed   : > { %1835 = vmatpush3.bf16.msra.mxu1 %v2058_v48 }
 0x4ee   : > { %1836 = vmatprep.subr.bf16.mxu1 %v2567_v9 }
 0x4f0   : > { %v3111_v49 = vpop.f32.mrb[4].mxu1 }
 0x4f1   : > { %v1814_v50 = vpop.f32.mrb[5].mxu1  ;;  %v1001_v58 = vsel %vm767_vm4, %v3111_v49, -inf }
 0x4f2   : > { %v998_v51 = vpop.f32.mrb[6].mxu1 }
 0x4f3   : > { %v1815_v52 = vpop.f32.mrb[7].mxu1  ;;  %v2059_v51 = vld [vmem:[#allocation12 + $0x8] sm:$0xff]  }
 0x4f4   : > { %1837 = vmatpush3.bf16.msra.mxu1 %v2059_v51 }
 0x4f5   : > { %1850 = vmatprep.subr.bf16.mxu1 %v2567_v9 }
 0x4f7   : > { %779 = vrot.lane.b32.xlu1 %v3079_v26, %s2576_s2 }
 0x4f8   : > { %v1111_v53 = vpop.f32.mrb[8].mxu1 }
 0x4f9   : > { %v1826_v54 = vpop.f32.mrb[9].mxu1  ;;  %v1117_v55 = vsel %vm767_vm4, %v1111_v53, -inf }
 0x4fa   : > { %1118 = vmax.xlane.f32.xlu0 %v1117_v55  ;;  %v1114_v56 = vpop.f32.mrb[10].mxu1 }
 0x4fb   : > { %v1827_v57 = vpop.f32.mrb[11].mxu1 }
 0x510   : > { %896 = vrot.lane.b32.xlu0 %v3079_v26, %s2577_s17 }
 0x51b   : > { %1002 = vmax.xlane.f32.xlu1 %v1001_v58 }
 0x52c   : > { %1012 = vrot.lane.b32.xlu1 %v3079_v26, %s2578_s23  ;;  %s3272_s23 = sld [smem:[#allocation39_spill]] }
 0x530   : > { %1128 = vrot.lane.b32.xlu1 %v3079_v26, %s2579_s24 }
 0x532   : > { %s3169_s24 = scalar_lea.hbm %s3272_s23, %s1741_s16 }
 0x573   : > { %v770_v61 = vpop.xlane.xlu1 %769 }
 0x574   : > { %v771_v62 = vsub.f32 %v761_v39, %v770_v61 }
 0x576   : > { %v772_v0 = vmul.f32 1.442695, %v771_v62 }
 0x577   : > { %v887_v2 = vpop.xlane.xlu0 %886  ;;  %v780_v3 = vpop.permute.xlu1 %779 }
 0x578   : > { %2072 = vpow2.f32 %v772_v0  ;;  %v888_v4 = vsub.f32 %v879_v44, %v887_v2  ;;  %v790_v5 = vand.u32 %v788_v63, %v780_v3 }
 0x57a   : > { %v889_v6 = vmul.f32 1.442695, %v888_v4  ;;  %1793 = vmatpush3.bf16.msra.mxu0 %v790_v5  ;;  %v1720_v4 = vld [vmem:[#allocation14] ss:$0 sm:$0xff] }
 0x57b   : > { %1804 = vmatprep.subr.bf16.mxu0 %v2567_v9 }
 0x57c   : > { %2074 = vpow2.f32 %v889_v6 }
 0x582   : > { %v2073_v7 = vpop.eup %2072 }
 0x583   : > { %v778_v8 = vpack.c.bf16 %v2073_v7, %v2073_v7  ;;  %v774_v20 = vsel %vm767_vm4, %v2073_v7, 0.0 }
 0x585   : > { %1795 = vmatmul.mubr.msk.bf16.vlgmr.msra.gmra.mrb[8].mxu0 %vm781_vm7, %v778_v8 }
 0x586   : > { %v2075_v10 = vpop.eup %2074  ;;  %1806 = vmatprep.mubr.msk.bf16.mxu0 %vm2568_vm1, %v2567_v9 }
 0x587   : > { %v1119_v11 = vpop.xlane.xlu0 %1118  ;;  %v891_v12 = vsel %vm767_vm4, %v2075_v10, 0.0  ;;  %v895_v17 = vpack.c.bf16 %v2075_v10, %v2075_v10 }
 0x588   : > { %v1120_v13 = vsub.f32 %v1111_v53, %v1119_v11  ;;  %892 = vadd.xlane.f32.xlu0 %v891_v12 }
 0x58a   : > { %v1121_v14 = vmul.f32 1.442695, %v1120_v13 }
 0x58b   : > { %v897_v15 = vpop.permute.xlu0 %896 }
 0x58c   : > { %2076 = vpow2.f32 %v1121_v14  ;;  %v902_v16 = vand.u32 %v897_v15, %v788_v63 }
 0x58e   : > { %1805 = vmatpush3.bf16.msra.mxu0 %v902_v16 }
 0x58f   : > { %1816 = vmatprep.subr.bf16.mxu0 %v2567_v9 }
 0x591   : > { %1807 = vmatmul.mubr.msk.bf16.vlgmr.msra.gmra.mrb[12].mxu0 %vm781_vm7, %v895_v17 }
 0x592   : > { %1818 = vmatprep.mubr.msk.bf16.mxu0 %vm2568_vm1, %v2567_v9 }
 0x596   : > { %v2077_v18 = vpop.eup %2076 }
 0x597   : > { %v1123_v19 = vsel %vm767_vm4, %v2077_v18, 0.0  ;;  %v1127_v31 = vpack.c.bf16 %v2077_v18, %v2077_v18  ;;  %v2060_v18 = vld [vmem:[#allocation18] sm:$0xff]  }
 0x598   : > { %1124 = vadd.xlane.f32.xlu0 %v1123_v19  ;;  %v2061_v19 = vld [vmem:[#allocation18 + $0x8] sm:$0xff]  }
 0x59c   : > { %775 = vadd.xlane.f32.xlu0 %v774_v20 }
 0x5a8   : > { %v1003_v21 = vpop.xlane.xlu1 %1002 }
 0x5a9   : > { %v1004_v22 = vsub.f32 %v3111_v49, %v1003_v21 }
 0x5ab   : > { %v1005_v23 = vmul.f32 1.442695, %v1004_v22 }
 0x5ac   : > { %v1013_v24 = vpop.permute.xlu1 %1012 }
 0x5ad   : > { %2078 = vpow2.f32 %v1005_v23  ;;  %v1018_v25 = vand.u32 %v1013_v24, %v788_v63  ;;  %v1724_v23 = vld [vmem:[#allocation15] ss:$0 sm:$0xff] }
 0x5af   : > { %1817 = vmatpush3.bf16.msra.mxu0 %v1018_v25  ;;  %v1725_v25 = vld [vmem:[#allocation17] ss:$0 sm:$0xff] }
 0x5b0   : > { %1828 = vmatprep.subr.bf16.mxu0 %v2567_v9  ;;  %v1129_v26 = vpop.permute.xlu1 %1128 }
 0x5b1   : > { %v1134_v30 = vand.u32 %v1129_v26, %v788_v63 }
 0x5b7   : > { %v2079_v27 = vpop.eup %2078 }
 0x5b8   : > { %v1007_v28 = vsel %vm767_vm4, %v2079_v27, 0.0  ;;  %v1011_v29 = vpack.c.bf16 %v2079_v27, %v2079_v27 }
 0x5b9   : > { %1008 = vadd.xlane.f32.xlu1 %v1007_v28 }
 0x5ba   : > { %1819 = vmatmul.mubr.msk.bf16.vlgmr.msra.gmra.mrb[16].mxu0 %vm781_vm7, %v1011_v29  ;;  %v2062_v29 = vld [vmem:[#allocation21] sm:$0xff]  }
 0x5bb   : > { %1829 = vmatpush3.bf16.msra.mxu0 %v1134_v30  ;;  %1830 = vmatprep.mubr.msk.bf16.mxu0 %vm2568_vm1, %v2567_v9  ;;  %v2063_v30 = vld [vmem:[#allocation21 + $0x8] sm:$0xff]  }
 0x5bc   : > { %1842 = vmatprep.subr.bf16.mxu0 %v2567_v9 }
 0x5c2   : > { %1831 = vmatmul.mubr.msk.bf16.vlgmr.msra.gmra.mrb[20].mxu0 %vm781_vm7, %v1127_v31  ;;  %v2064_v31 = vld [vmem:[#allocation21 + $0x10] sm:$0xff]  }
 0x5c3   : > { %1846 = vmatprep.mubr.msk.bf16.mxu0 %vm2568_vm1, %v2567_v9  ;;  %1843 = vmatpush3.bf16.msra.mxu0 %v2060_v18 }
 0x5c4   : > { %1844 = vmatprep.subr.bf16.mxu0 %v2567_v9 }
 0x5c7   : > { %1845 = vmatpush3.bf16.msra.mxu0 %v2061_v19 }
 0x615   : > { %v893_v32 = vpop.xlane.xlu0 %892 }
 0x625   : > { %v1125_v33 = vpop.xlane.xlu0 %1124 }
 0x629   : > { %v776_v34 = vpop.xlane.xlu0 %775 }
 0x62a   : > { %2080 = vrcp.f32 %v776_v34  ;;  %v2067_v34 = vld [vmem:[#allocation21 + $0x28] sm:$0xff]  }
 0x62b   : > { %2082 = vrcp.f32 %v893_v32  ;;  %v2065_v32 = vld [vmem:[#allocation21 + $0x18] sm:$0xff]  }
 0x634   : > { %v2081_v35 = vpop.eup %2080 }
 0x635   : > { %v2083_v41 = vpop.eup %2082 }
 0x646   : > { %v1009_v47 = vpop.xlane.xlu1 %1008 }
 0x647   : > { %2084 = vrcp.f32 %v1009_v47 }
 0x648   : > { %2086 = vrcp.f32 %v1125_v33  ;;  %v2066_v33 = vld [vmem:[#allocation21 + $0x20] sm:$0xff]  }
 0x651   : > { %v2085_v49 = vpop.eup %2084 }
 0x652   : > { %v2087_v56 = vpop.eup %2086 }
 0x658   : > { %v826_v36 = vpop.f32.mrb[8].mxu0 }
 0x659   : > { %v832_v37 = vmul.f32 %v2081_v35, %v826_v36  ;;  %v1796_v38 = vpop.f32.mrb[9].mxu0  ;;  %v2068_v35 = vld [vmem:[#allocation21 + $0x30] sm:$0xff]   ;;  %v2069_v36 = vld [vmem:[#allocation21 + $0x38] sm:$0xff]  }
 0x65a   : > { %v829_v39 = vpop.f32.mrb[10].mxu0 }
 0x65b   : > { %834 = vst.msk [vmem:[#allocation2] sm:$0x1f] %vm833_vm8, %v832_v37  ;;  %v1797_v40 = vpop.f32.mrb[11].mxu0  ;;  %v1726_v37 = vld [vmem:[#allocation20] ss:$0 sm:$0xff] }
 0x664   : > { %v938_v42 = vpop.f32.mrb[12].mxu0 }
 0x665   : > { %v944_v43 = vmul.f32 %v2083_v41, %v938_v42  ;;  %v1808_v44 = vpop.f32.mrb[13].mxu0 }
 0x666   : > { %v941_v45 = vpop.f32.mrb[14].mxu0 }
 0x667   : > { %946 = vrot.lane.b32.xlu1 %v944_v43, %s2581_s20  ;;  %v1809_v46 = vpop.f32.mrb[15].mxu0  ;;  %s1477_s20 = scalar_lea.sflag [#allocation5], %s3028_s19 }
 0x68d   : > { %v1054_v50 = vpop.f32.mrb[16].mxu0 }
 0x68e   : > { %v1060_v52 = vmul.f32 %v2085_v49, %v1054_v50  ;;  %v1820_v53 = vpop.f32.mrb[17].mxu0 }
 0x68f   : > { %v1057_v54 = vpop.f32.mrb[18].mxu0 }
 0x690   : > { %1062 = vrot.lane.b32.xlu0 %v1060_v52, %s2582_s14  ;;  %v1821_v55 = vpop.f32.mrb[19].mxu0  ;;  %s2464_s14 = sshll.u32 %s2584_s0, 4  ;;  %s2465_s14 = int_to_ptr.vmem [resolvable:$false] %s2464_s14 }
 0x691   : > { %p2467_p12 = scmp.lt.s32.totalorder %s3171_s30, %s2465_s14 }
 0x695   : > { %v1170_v57 = vpop.f32.mrb[20].mxu0 }
 0x696   : > { %v1176_v58 = vmul.f32 %v2087_v56, %v1170_v57  ;;  %v1832_v59 = vpop.f32.mrb[21].mxu0  ;;  %v1473_v56 = vld [vmem:[%s613_s22] sm:$0x7] }
 0x697   : > { %v1173_v60 = vpop.f32.mrb[22].mxu0 }
 0x698   : > { %1178 = vrot.lane.b32.xlu1 %v1176_v58, %s2583_s13  ;;  %v1833_v61 = vpop.f32.mrb[23].mxu0  ;;  %s2466_s13 = scalar_lea.vmem %s2465_s14, 128 }
 0x699   : > { %p2468_p8 = scmp.lt.s32.totalorder %s2466_s13, %s2460_s15 }
 0x69b   : > { %p2469_p5 = por %p2468_p8, %p2467_p12 }
 0x69d   : > { %p2470_p7 = pnand %p2469_p5, %p2463_p11 }
 0x6d9   : > { %v947_v62 = vpop.permute.xlu1 %946 }
 0x6da   : > { %950 = vst.msk [vmem:[#allocation2] sm:$0x1f] %vm949_vm9, %v947_v62 }
 0x702   : > { %v1063_v63 = vpop.permute.xlu0 %1062 }
 0x703   : > { %1066 = vst.msk [vmem:[#allocation2] sm:$0x1f] %vm1065_vm10, %v1063_v63 }
 0x70a   : > { %v1179_v0 = vpop.permute.xlu1 %1178 }
 0x70b   : > { %1182 = vst.msk [vmem:[#allocation2] sm:$0x1f] %vm1181_vm11, %v1179_v0 }
 0x712   : > { %v1183_v2 = vld [vmem:[#allocation2] sm:$0x1f] }
 0x713   : > { %v1184_v3 = vpack.c.bf16 %v1183_v2, %v1183_v2 }
 0x715   : > { %1839 = vmatmul.mubr.msk.bf16.vlgmr.msra.gmra.mrb[12].mxu1 %vm672_vm2, %v1184_v3 }
 0x716   : > { %1866 = vmatprep.mubr.msk.bf16.mxu1 %vm2568_vm1, %v2567_v9  ;;  %1851 = vmatpush3.bf16.msra.mxu1 %v2062_v29 }
 0x717   : > { %1852 = vmatprep.subr.bf16.mxu1 %v2567_v9 }
 0x71a   : > { %1853 = vmatpush3.bf16.msra.mxu1 %v2063_v30 }
 0x71b   : > { %1854 = vmatprep.subr.bf16.mxu1 %v2567_v9 }
 0x71e   : > { %1855 = vmatpush3.bf16.msra.mxu1 %v2064_v31 }
 0x71f   : > { %1856 = vmatprep.subr.bf16.mxu1 %v2567_v9 }
 0x722   : > { %1857 = vmatpush3.bf16.msra.mxu1 %v2065_v32 }
 0x723   : > { %1858 = vmatprep.subr.bf16.mxu1 %v2567_v9 }
 0x726   : > { %1859 = vmatpush3.bf16.msra.mxu1 %v2066_v33 }
 0x727   : > { %1860 = vmatprep.subr.bf16.mxu1 %v2567_v9 }
 0x72a   : > { %1861 = vmatpush3.bf16.msra.mxu1 %v2067_v34 }
 0x72b   : > { %1862 = vmatprep.subr.bf16.mxu1 %v2567_v9 }
 0x72e   : > { %1863 = vmatpush3.bf16.msra.mxu1 %v2068_v35 }
 0x72f   : > { %1864 = vmatprep.subr.bf16.mxu1 %v2567_v9  ;;  %v1731_v9 = vld [vmem:[#allocation23] ss:$0 sm:$0xff] }
 0x732   : > { %1865 = vmatpush3.bf16.msra.mxu1 %v2069_v36 }
 0x7e8   : > { %v1245_v5 = vpop.f32.mrb[12].mxu1 }
 0x7e9   : > { %v1246_v6 = vadd.f32 %v1720_v4, %v1245_v5  ;;  %v1840_v7 = vpop.f32.mrb[13].mxu1 }
 0x7ea   : > { %v1248_v8 = vpop.f32.mrb[14].mxu1 }
 0x7eb   : > { %v3147_v10 = vadd.f32 %v1246_v6, %v3062_v1  ;;  %v1841_v11 = vpop.f32.mrb[15].mxu1 }
 0x7ed   : > { %v1254_v12 = vsel %vm619_vm0, %v3147_v10, 0.0 }
 0x7ee   : > { %1255 = vadd.xlane.f32.xlu1 %v1254_v12 }
 0x87b   : > { %v1256_v13 = vpop.xlane.xlu1 %1255 }
 0x87c   : > { %v1257_v14 = vmul.f32 0.03125, %v1256_v13 }
 0x87e   : > { %v1258_v15 = vsub.f32 %v3147_v10, %v1257_v14 }
 0x880   : > { %v1259_v16 = vmul.f32 %v1258_v15, %v1258_v15 }
 0x882   : > { %v1260_v17 = vsel %vm619_vm0, %v1259_v16, 0.0 }
 0x883   : > { %1261 = vadd.xlane.f32.xlu0 %v1260_v17 }
 0x910   : > { %v1262_v1 = vpop.xlane.xlu0 %1261 }
 0x911   : > { %v1263_v20 = vmul.f32 0.03125, %v1262_v1 }
 0x913   : > { %v1264_v21 = vadd.f32 1e-05, %v1263_v20 }
 0x915   : > { %2088 = vrsqrt.f32 %v1264_v21 }
 0x91f   : > { %v2089_v22 = vpop.eup %2088 }
 0x920   : > { %v1266_v24 = vmul.f32 %v2089_v22, %v1258_v15 }
 0x922   : > { %v1273_v26 = vmul.f32 %v1724_v23, %v1266_v24 }
 0x924   : > { %v1280_v27 = vadd.f32 %v1725_v25, %v1273_v26 }
 0x926   : > { %v1281_v28 = vpack.c.bf16 %v1280_v27, %v1280_v27 }
 0x928   : > { %1847 = vmatmul.mubr.msk.bf16.vlgmr.msra.gmra.mrb[24].mxu0 %vm672_vm2, %v1281_v28 }
 0x9fb   : > { %v1342_v38 = vpop.f32.mrb[24].mxu0 }
 0x9fc   : > { %v1343_v39 = vadd.f32 %v1726_v37, %v1342_v38  ;;  %v1848_v40 = vpop.f32.mrb[25].mxu0 }
 0x9fd   : > { %v1345_v41 = vpop.f32.mrb[26].mxu0 }
 0x9fe   : > { %v1730_v42 = vmul.f32 -1.702, %v1343_v39  ;;  %v1849_v43 = vpop.f32.mrb[27].mxu0 }
 0xa00   : > { %v1350_v44 = vmul.f32 1.442695, %v1730_v42 }
 0xa02   : > { %2090 = vpow2.f32 %v1350_v44 }
 0xa0c   : > { %v2091_v45 = vpop.eup %2090 }
 0xa0d   : > { %v1352_v46 = vadd.f32 1.0, %v2091_v45 }
 0xa0f   : > { %2092 = vrcp.f32 %v1352_v46 }
 0xa19   : > { %v2093_v47 = vpop.eup %2092 }
 0xa1a   : > { %v1355_v48 = vmul.f32 %v2093_v47, %v1343_v39 }
 0xa1c   : > { %v1356_v49 = vpack.c.bf16 %v1355_v48, %v1355_v48 }
 0xa1e   : > { %1867 = vmatmul.mubr.bf16.vlgmr.msra.gmra.mrb[16].mxu1 %v1356_v49 }
 0xaf1   : > { %v1462_v50 = vpop.f32.mrb[16].mxu1 }
 0xaf2   : > { %v1463_v51 = vadd.f32 %v1731_v9, %v1462_v50  ;;  %v1868_v52 = vpop.f32.mrb[17].mxu1 }
 0xaf3   : > { %v1465_v53 = vpop.f32.mrb[18].mxu1 }
 0xaf4   : > { %v1468_v54 = vadd.f32 %v1463_v51, %v3147_v10  ;;  %v1869_v55 = vpop.f32.mrb[19].mxu1 }
 0xaf6   : > { %v1469_v57 = vpack.c.bf16 %v1468_v54, %v1468_v54 }
 0xaf8   : > { %v1474_v58 = vsel %vm1472_vm14, %v1469_v57, %v1473_v56 }
 0xaf9   : > { %1475 = vst [vmem:[%s613_s22] sm:$0x7] %v1474_v58 }
 0xafa   : > { %2473 = shalt.err (!%p2470_p7)
}
 0xafb   : > { %s2474_s19 = scalar_lea.hbm %s3169_s24, 64  ;;  %s2478_s2 = scalar_lea.hbm %s3272_s23, 128 }
 0xafc   : > { %p2475_p6 = scmp.ne.s32.totalorder %s3169_s24, %s2474_s19  ;;  %p2479_p13 = scmp.lt.u32.totalorder %s3169_s24, %s3272_s23 }
 0xafd   : > { %p2480_p1 = scmp.lt.u32.totalorder %s2478_s2, %s2474_s19  ;;  %p2482_p2 = scmp.lt.u32.totalorder %s2474_s19, %s3169_s24 }
 0xafe   : > { %p2476_p9 = pnand %p2475_p6, %p3273_p0 }
 0xaff   : > { %p2481_p3 = por %p2480_p1, %p2479_p13 }
 0xb00   : > { %p2477_p4 = pneg %p2476_p9 }
 0xb01   : > { %p2483_p10 = por %p2482_p2, %p2481_p3 }
 0xb03   : > { %p2484_p11 = pnand %p2483_p10, %p2477_p4 }
 0xb05   : > { %2487 = shalt.err (!%p2484_p11)
}
 0xb06   : > { %1920 = dma.vmem_to_hbm [thread:$0]  (%p3273_p0), %s3171_s30, 64, %s3169_s24, %s1477_s20  }
 0xb07 PF: > { %s1502_s15 = sand.u32 1, %s2538_s25   ;;  %p3274_p12 = scmp.ne.s32.totalorder %s3254_s21, 0 }
 0xb08   : > { %p3275_p8 = scmp.ge.s32.totalorder %s2550_s28, 2  ;;  %s1503_s14 = scalar_lea.sflag [#allocation5], %s1502_s15 }
 0xb0a   : > { %p1964_p5 = pnand %p3275_p8, %p3274_p12 }
 0xb0c   : > { %2533 = dma.done.wait (!%p1964_p5), %s1503_s14, 64  }
 0xb0d   : > { %2535 = vsyncadd (!%p1964_p5), %s1503_s14, 4294967232  ;;  %p32_p7 = scmp.ge.s32.totalorder %s2952_s18, 4   ;;  %s3276_s25 = smov %s2542_s26 }
 0xb0e   : > { %s3277_s26 = smov %s2546_s27  ;;  %s3278_s27 = smov %s2963_s29 }
 0xb0f   : > { %s3279_s28 = smov %s2952_s18  ;;  %34 = sbr.rel (!%p32_p7) target bundleno = 17 (0x11), region = 165 }
 0xb16   :  { %1508 = vsyncpa [#allocation4], 1 }
 0xb17   :  { %1510 = vsyncpa [#allocation4 + $0x1], 1 }
 0xb18   :  { %1511 = vsyncpa [#allocation7], 1 }
 0xb19   :  { %1512 = vsyncpa [#allocation10], 1 }
 0xb1a   :  { %1513 = vsyncpa [#allocation13], 1 }
 0xb1b   :  { %1514 = vsyncpa [#allocation16], 1 }
 0xb1c   :  { %1515 = vsyncpa [#allocation19], 1 }
 0xb1d   :  { %1516 = vsyncpa [#allocation22], 1 }
 0xb1e   :  { %1517 = vsyncpa [#allocation5], 1 }
 0xb1f   :  { %1519 = vsyncpa [#allocation5 + $0x1], 1 }

</bundles_post_ra>
